<compile_context>
chip_gen: v7x
topology: tpu7x:2x2x1
jax: 0.10.0
libtpu: 0.0.40
codegen_flags: <defaults>
</compile_context>

<pallas_src>
import jax
import jax.numpy as jnp
from jax.experimental import pallas as pl
from jax.experimental.pallas import tpu as pltpu


def _round_up(x, m):
    return ((x + m - 1) // m) * m


# ----------------------------- Pallas kernels ------------------------------ #

def _make_fused_kernel(*, wp, kh, kw, m, residual):
    """relu(sum_taps x[tap_slice] @ W_tap + shift [+ res]) on flattened image."""
    def kernel(x_ref, w_ref, sh_ref, *rest):
        if residual:
            res_ref, o_ref = rest
        else:
            (o_ref,) = rest
        cout_p = w_ref.shape[-1]
        acc = jnp.zeros((m, cout_p), jnp.float32)
        for i in range(kh):
            for j in range(kw):
                off = i * wp + j                      # static tap offset
                acc = acc + jnp.dot(x_ref[off:off + m, :], w_ref[i * kw + j],
                                    preferred_element_type=jnp.float32)
        acc = acc + sh_ref[...]                       # folded bias + BN shift
        if residual:
            acc = acc + res_ref[...].astype(jnp.float32)
        o_ref[...] = jnp.maximum(acc, 0.0).astype(o_ref.dtype)
    return kernel


def _matmul_epilogue_kernel(p_ref, w_ref, sh_ref, o_ref):
    """relu(patches @ W_folded + shift) for the im2col (stride > 1) fallback."""
    acc = jnp.dot(p_ref[...], w_ref[...], preferred_element_type=jnp.float32)
    acc = acc + sh_ref[...]
    o_ref[...] = jnp.maximum(acc, 0.0).astype(o_ref.dtype)


# ------------------------------- JAX glue ---------------------------------- #

def _fold_bn(w, b, gamma, beta, rmean, rvar, eps):
    scale = gamma / jnp.sqrt(rvar + eps)                  # (cout,)
    w_folded = w * scale[:, None, None, None]             # (cout, cin, kh, kw)
    shift = b * scale + beta - rmean * scale               # (cout,)
    return w_folded, shift


def _conv_fused(x, w_folded, shift_p, *, n, cin, cout, cout_p, h, wdim,
                kh, kw, padding, oh, ow, residual):
    """stride == 1: fused im2col (flat-image tap slices) inside the kernel."""
    hp, wp = h + 2 * padding, wdim + 2 * padding
    m = oh * wp                     # flat output rows per image (incl. garbage cols)
    m_in = hp * wp + (kw - 1)       # flat input rows incl. small tail pad

    # NHWC, spatially padded, flattened to (N, Hp*Wp + kw-1, Cin), bf16.
    x_nhwc = x.transpose(0, 2, 3, 1)
    xp = jnp.pad(x_nhwc, ((0, 0), (padding, padding), (padding, padding), (0, 0)))
    xf = xp.reshape(n, hp * wp, cin)
    xf = jnp.pad(xf, ((0, 0), (0, kw - 1), (0, 0))).astype(jnp.bfloat16)

    # Weight -> (KH*KW, Cin, Cout_p), BN already folded in, bf16, lane-dense.
    wt = w_folded.transpose(2, 3, 1, 0).reshape(kh * kw, cin, cout)
    wt = jnp.pad(wt, ((0, 0), (0, 0), (0, cout_p - cout))).astype(jnp.bfloat16)

    args = [xf, wt, shift_p]
    in_specs = [
        pl.BlockSpec((None, m_in, cin), lambda bi: (bi, 0, 0)),
        pl.BlockSpec((kh * kw, cin, cout_p), lambda bi: (0, 0, 0)),
        pl.BlockSpec((1, cout_p), lambda bi: (0, 0)),
    ]
    if residual:
        # Residual laid out in the same (oh, wp) flat coordinates, f32 (exact).
        res = jnp.pad(x_nhwc, ((0, 0), (0, 0), (0, wp - ow), (0, cout_p - cout)))
        res = res.reshape(n, oh * wp, cout_p)
        args.append(res)
        in_specs.append(pl.BlockSpec((None, m, cout_p), lambda bi: (bi, 0, 0)))

    kernel = _make_fused_kernel(wp=wp, kh=kh, kw=kw, m=m, residual=residual)
    out = pl.pallas_call(
        kernel,
        out_shape=jax.ShapeDtypeStruct((n, m, cout_p), x.dtype),
        grid=(n,),
        in_specs=in_specs,
        out_specs=pl.BlockSpec((None, m, cout_p), lambda bi: (bi, 0, 0)),
        compiler_params=pltpu.CompilerParams(dimension_semantics=("parallel",)),
    )(*args)

    out = out.reshape(n, oh, wp, cout_p)[:, :, :ow, :cout]   # drop garbage/pad
    return out.transpose(0, 3, 1, 2)                          # -> NCHW


def _im2col(x_nchw, kh, kw, stride, padding):
    """(N, C, H, W) -> (N*OH*OW, C*kh*kw), col order (c, kh, kw)."""
    n, c, h, w = x_nchw.shape
    xp = jnp.pad(x_nchw, ((0, 0), (0, 0), (padding, padding), (padding, padding)))
    oh = (h + 2 * padding - kh) // stride + 1
    ow = (w + 2 * padding - kw) // stride + 1
    cols = []
    for i in range(kh):
        for j in range(kw):
            cols.append(xp[:, :, i:i + stride * oh:stride, j:j + stride * ow:stride])
    cols = jnp.stack(cols, axis=0).reshape(kh, kw, n, c, oh, ow)
    cols = cols.transpose(2, 4, 5, 3, 0, 1)                  # (N, OH, OW, C, KH, KW)
    return cols.reshape(n * oh * ow, c * kh * kw)


def _conv_im2col(x, w_folded, shift_p, *, n, cin, cout, cout_p, kh, kw,
                 stride, padding, oh, ow):
    """stride > 1 fallback: wrapper-side im2col + one fused matmul kernel."""
    patches = _im2col(x, kh, kw, stride, padding).astype(jnp.bfloat16)   # (M, K)
    m, k = patches.shape
    tm = 512 if m >= 512 else _round_up(m, 8)
    mp = _round_up(m, tm)
    if mp != m:
        patches = jnp.pad(patches, ((0, mp - m), (0, 0)))

    w2 = w_folded.reshape(cout, k).T                                      # (K, Cout)
    w2 = jnp.pad(w2, ((0, 0), (0, cout_p - cout))).astype(jnp.bfloat16)

    out = pl.pallas_call(
        _matmul_epilogue_kernel,
        out_shape=jax.ShapeDtypeStruct((mp, cout_p), x.dtype),
        grid=(mp // tm,),
        in_specs=[
            pl.BlockSpec((tm, k), lambda i: (i, 0)),
            pl.BlockSpec((k, cout_p), lambda i: (0, 0)),
            pl.BlockSpec((1, cout_p), lambda i: (0, 0)),
        ],
        out_specs=pl.BlockSpec((tm, cout_p), lambda i: (i, 0)),
        compiler_params=pltpu.CompilerParams(dimension_semantics=("parallel",)),
    )(patches, w2, shift_p)

    return out[:m, :cout].reshape(n, oh, ow, cout).transpose(0, 3, 1, 2)


def conv2d_bn_relu_pallas(x, params, *, stride, padding, residual=False):
    """Pallas implementation of Conv2d(conv + BN) -> (+x if residual) -> ReLU."""
    w, b, gamma, beta, rmean, rvar, eps = params
    n, cin, h, wdim = x.shape
    cout, _, kh, kw = w.shape
    oh = (h + 2 * padding - kh) // stride + 1
    ow = (wdim + 2 * padding - kw) // stride + 1
    cout_p = _round_up(cout, 128)

    w_folded, shift = _fold_bn(w, b, gamma, beta, rmean, rvar, eps)
    shift_p = jnp.pad(shift, (0, cout_p - cout)).reshape(1, cout_p).astype(jnp.float32)

    if residual:
        assert stride == 1 and cin == cout and oh == h and ow == wdim, \
            "residual path needs stride=1 and matching shapes"

    if stride == 1:
        return _conv_fused(x, w_folded, shift_p, n=n, cin=cin, cout=cout,
                           cout_p=cout_p, h=h, wdim=wdim, kh=kh, kw=kw,
                           padding=padding, oh=oh, ow=ow, residual=residual)
    return _conv_im2col(x, w_folded, shift_p, n=n, cin=cin, cout=cout,
                        cout_p=cout_p, kh=kh, kw=kw, stride=stride,
                        padding=padding, oh=oh, ow=ow)


# ------------------------ reference (pure JAX / XLA) ------------------------ #

def conv2d_bn_relu_ref(x, params, *, stride, padding, residual=False):
    w, b, gamma, beta, rmean, rvar, eps = params
    out = jax.lax.conv_general_dilated(
        x, w, window_strides=(stride, stride),
        padding=((padding, padding), (padding, padding)),
        dimension_numbers=("NCHW", "OIHW", "NCHW"))
    out = out + b[None, :, None, None]
    scale = gamma / jnp.sqrt(rvar + eps)
    shift = beta - rmean * scale
    out = out * scale[None, :, None, None] + shift[None, :, None, None]
    if residual:
        out = out + x
    return jnp.maximum(out, 0.0)


# ------------------------------ param init --------------------------------- #

def init_params(key, cin, cout, ksize):
    k_w, k_b, k_g, k_be, k_m, k_v = jax.random.split(key, 6)
    fan_in = cin * ksize * ksize
    bound = 1.0 / (fan_in ** 0.5)
    w = jax.random.uniform(k_w, (cout, cin, ksize, ksize), jnp.float32, -bound, bound)
    b = jax.random.uniform(k_b, (cout,), jnp.float32, -bound, bound)
    gamma = 1.0 + 0.1 * jax.random.normal(k_g, (cout,), jnp.float32)
    beta = 0.1 * jax.random.normal(k_be, (cout,), jnp.float32)
    rmean = 0.1 * jax.random.normal(k_m, (cout,), jnp.float32)
    rvar = jnp.abs(jax.random.normal(k_v, (cout,), jnp.float32)) + 0.5
    eps = 1e-5
    return (w, b, gamma, beta, rmean, rvar, eps)


# ---------------------------------- main ------------------------------------ #

if __name__ == "__main__":
    key = jax.random.PRNGKey(0)
    kx, kp1, kp2, kp3 = jax.random.split(key, 4)

    # bf16 MXU operands vs. the pure-f32 reference -> loose tolerance.
    TOL = dict(atol=1e-1, rtol=2e-2)

    # Case 1: plain conv block (cin != cout), stride 1 (fused-im2col path).
    n, cin, h, wdim = 2, 4, 16, 16
    cout, ksize, stride, padding = 8, 3, 1, 1
    x = jax.random.normal(kx, (n, cin, h, wdim), jnp.float32)
    params = init_params(kp1, cin, cout, ksize)
    out = jax.block_until_ready(
        conv2d_bn_relu_pallas(x, params, stride=stride, padding=padding))
    ref = conv2d_bn_relu_ref(x, params, stride=stride, padding=padding)
    assert out.shape == (n, cout, h, wdim)
    assert jnp.allclose(out, ref, **TOL), float(jnp.max(jnp.abs(out - ref)))

    # Case 2: residual block (cin == cout, stride 1, same padding).
    cin2 = cout2 = 8
    x2 = jax.random.normal(kx, (n, cin2, h, wdim), jnp.float32)
    params2 = init_params(kp2, cin2, cout2, ksize)
    out2 = jax.block_until_ready(
        conv2d_bn_relu_pallas(x2, params2, stride=1, padding=1, residual=True))
    ref2 = conv2d_bn_relu_ref(x2, params2, stride=1, padding=1, residual=True)
    assert out2.shape == (n, cout2, h, wdim)
    assert jnp.allclose(out2, ref2, **TOL), float(jnp.max(jnp.abs(out2 - ref2)))

    # Case 3: strided conv (stride 2) -> im2col fallback path.
    params3 = init_params(kp3, cin, cout, ksize)
    out3 = jax.block_until_ready(
        conv2d_bn_relu_pallas(x, params3, stride=2, padding=1))
    ref3 = conv2d_bn_relu_ref(x, params3, stride=2, padding=1)
    assert out3.shape == (n, cout, 8, 8)
    assert jnp.allclose(out3, ref3, **TOL), float(jnp.max(jnp.abs(out3 - ref3)))

    print("KERNEL_OK")
</pallas_src>

<mosaic_0001>
module attributes {stable_mosaic.version = 11 : i64} {
  func.func @kernel(%arg0: i32, %arg1: memref<1x326x4xbf16, #tpu.memory_space<vmem>>, %arg2: memref<9x4x128xbf16, #tpu.memory_space<vmem>>, %arg3: memref<1x128xf32, #tpu.memory_space<vmem>>, %arg4: memref<1x288x128xf32, #tpu.memory_space<vmem>>) attributes {dimension_semantics = [#tpu.dimension_semantics<parallel>], iteration_bounds = array<i64: 2>, scalar_prefetch = 0 : i64, scratch_operands = 0 : i64, tpu.core_type = #tpu.core_type<tc>, window_params = [{transform_indices = @transform_0, window_bounds = array<i64: 1, 326, 4>}, {pipeline_mode = #tpu.pipeline_mode<synchronous>, transform_indices = @transform_1, window_bounds = array<i64: 9, 4, 128>}, {pipeline_mode = #tpu.pipeline_mode<synchronous>, transform_indices = @transform_2, window_bounds = array<i64: 1, 128>}, {transform_indices = @transform_3, window_bounds = array<i64: 1, 288, 128>}]} {
    %cst = arith.constant 0.000000e+00 : f32
    %0 = vector.broadcast %cst : f32 to vector<288x128xf32>
    %c0 = arith.constant 0 : index
    %c0_0 = arith.constant 0 : index
    %c0_1 = arith.constant 0 : index
    %1 = vector.load %arg1[%c0, %c0_0, %c0_1] : memref<1x326x4xbf16, #tpu.memory_space<vmem>>, vector<1x288x4xbf16>
    %2 = vector.shape_cast %1 : vector<1x288x4xbf16> to vector<288x4xbf16>
    %c0_2 = arith.constant 0 : index
    %c0_3 = arith.constant 0 : index
    %c0_4 = arith.constant 0 : index
    %3 = vector.load %arg2[%c0_2, %c0_3, %c0_4] : memref<9x4x128xbf16, #tpu.memory_space<vmem>>, vector<1x4x128xbf16>
    %4 = vector.shape_cast %3 : vector<1x4x128xbf16> to vector<4x128xbf16>
    %cst_5 = arith.constant dense<0.000000e+00> : vector<288x128xf32>
    %5 = tpu.matmul %2, %4, %cst_5 {dimension_numbers = #tpu.dot_dimension_numbers<[1], [0], [0], [1], [0, 0, 1, 1], [], []>} : vector<288x4xbf16>, vector<4x128xbf16>, vector<288x128xf32> -> vector<288x128xf32>
    %6 = arith.addf %0, %5 : vector<288x128xf32>
    %c0_6 = arith.constant 0 : index
    %c1 = arith.constant 1 : index
    %c0_7 = arith.constant 0 : index
    %7 = vector.load %arg1[%c0_6, %c1, %c0_7] : memref<1x326x4xbf16, #tpu.memory_space<vmem>>, vector<1x288x4xbf16>
    %8 = vector.shape_cast %7 : vector<1x288x4xbf16> to vector<288x4xbf16>
    %c1_8 = arith.constant 1 : index
    %c0_9 = arith.constant 0 : index
    %c0_10 = arith.constant 0 : index
    %9 = vector.load %arg2[%c1_8, %c0_9, %c0_10] : memref<9x4x128xbf16, #tpu.memory_space<vmem>>, vector<1x4x128xbf16>
    %10 = vector.shape_cast %9 : vector<1x4x128xbf16> to vector<4x128xbf16>
    %cst_11 = arith.constant dense<0.000000e+00> : vector<288x128xf32>
    %11 = tpu.matmul %8, %10, %cst_11 {dimension_numbers = #tpu.dot_dimension_numbers<[1], [0], [0], [1], [0, 0, 1, 1], [], []>} : vector<288x4xbf16>, vector<4x128xbf16>, vector<288x128xf32> -> vector<288x128xf32>
    %12 = arith.addf %6, %11 : vector<288x128xf32>
    %c0_12 = arith.constant 0 : index
    %c2 = arith.constant 2 : index
    %c0_13 = arith.constant 0 : index
    %13 = vector.load %arg1[%c0_12, %c2, %c0_13] : memref<1x326x4xbf16, #tpu.memory_space<vmem>>, vector<1x288x4xbf16>
    %14 = vector.shape_cast %13 : vector<1x288x4xbf16> to vector<288x4xbf16>
    %c2_14 = arith.constant 2 : index
    %c0_15 = arith.constant 0 : index
    %c0_16 = arith.constant 0 : index
    %15 = vector.load %arg2[%c2_14, %c0_15, %c0_16] : memref<9x4x128xbf16, #tpu.memory_space<vmem>>, vector<1x4x128xbf16>
    %16 = vector.shape_cast %15 : vector<1x4x128xbf16> to vector<4x128xbf16>
    %cst_17 = arith.constant dense<0.000000e+00> : vector<288x128xf32>
    %17 = tpu.matmul %14, %16, %cst_17 {dimension_numbers = #tpu.dot_dimension_numbers<[1], [0], [0], [1], [0, 0, 1, 1], [], []>} : vector<288x4xbf16>, vector<4x128xbf16>, vector<288x128xf32> -> vector<288x128xf32>
    %18 = arith.addf %12, %17 : vector<288x128xf32>
    %c0_18 = arith.constant 0 : index
    %c18 = arith.constant 18 : index
    %c0_19 = arith.constant 0 : index
    %19 = vector.load %arg1[%c0_18, %c18, %c0_19] : memref<1x326x4xbf16, #tpu.memory_space<vmem>>, vector<1x288x4xbf16>
    %20 = vector.shape_cast %19 : vector<1x288x4xbf16> to vector<288x4xbf16>
    %c3 = arith.constant 3 : index
    %c0_20 = arith.constant 0 : index
    %c0_21 = arith.constant 0 : index
    %21 = vector.load %arg2[%c3, %c0_20, %c0_21] : memref<9x4x128xbf16, #tpu.memory_space<vmem>>, vector<1x4x128xbf16>
    %22 = vector.shape_cast %21 : vector<1x4x128xbf16> to vector<4x128xbf16>
    %cst_22 = arith.constant dense<0.000000e+00> : vector<288x128xf32>
    %23 = tpu.matmul %20, %22, %cst_22 {dimension_numbers = #tpu.dot_dimension_numbers<[1], [0], [0], [1], [0, 0, 1, 1], [], []>} : vector<288x4xbf16>, vector<4x128xbf16>, vector<288x128xf32> -> vector<288x128xf32>
    %24 = arith.addf %18, %23 : vector<288x128xf32>
    %c0_23 = arith.constant 0 : index
    %c19 = arith.constant 19 : index
    %c0_24 = arith.constant 0 : index
    %25 = vector.load %arg1[%c0_23, %c19, %c0_24] : memref<1x326x4xbf16, #tpu.memory_space<vmem>>, vector<1x288x4xbf16>
    %26 = vector.shape_cast %25 : vector<1x288x4xbf16> to vector<288x4xbf16>
    %c4 = arith.constant 4 : index
    %c0_25 = arith.constant 0 : index
    %c0_26 = arith.constant 0 : index
    %27 = vector.load %arg2[%c4, %c0_25, %c0_26] : memref<9x4x128xbf16, #tpu.memory_space<vmem>>, vector<1x4x128xbf16>
    %28 = vector.shape_cast %27 : vector<1x4x128xbf16> to vector<4x128xbf16>
    %cst_27 = arith.constant dense<0.000000e+00> : vector<288x128xf32>
    %29 = tpu.matmul %26, %28, %cst_27 {dimension_numbers = #tpu.dot_dimension_numbers<[1], [0], [0], [1], [0, 0, 1, 1], [], []>} : vector<288x4xbf16>, vector<4x128xbf16>, vector<288x128xf32> -> vector<288x128xf32>
    %30 = arith.addf %24, %29 : vector<288x128xf32>
    %c0_28 = arith.constant 0 : index
    %c20 = arith.constant 20 : index
    %c0_29 = arith.constant 0 : index
    %31 = vector.load %arg1[%c0_28, %c20, %c0_29] : memref<1x326x4xbf16, #tpu.memory_space<vmem>>, vector<1x288x4xbf16>
    %32 = vector.shape_cast %31 : vector<1x288x4xbf16> to vector<288x4xbf16>
    %c5 = arith.constant 5 : index
    %c0_30 = arith.constant 0 : index
    %c0_31 = arith.constant 0 : index
    %33 = vector.load %arg2[%c5, %c0_30, %c0_31] : memref<9x4x128xbf16, #tpu.memory_space<vmem>>, vector<1x4x128xbf16>
    %34 = vector.shape_cast %33 : vector<1x4x128xbf16> to vector<4x128xbf16>
    %cst_32 = arith.constant dense<0.000000e+00> : vector<288x128xf32>
    %35 = tpu.matmul %32, %34, %cst_32 {dimension_numbers = #tpu.dot_dimension_numbers<[1], [0], [0], [1], [0, 0, 1, 1], [], []>} : vector<288x4xbf16>, vector<4x128xbf16>, vector<288x128xf32> -> vector<288x128xf32>
    %36 = arith.addf %30, %35 : vector<288x128xf32>
    %c0_33 = arith.constant 0 : index
    %c36 = arith.constant 36 : index
    %c0_34 = arith.constant 0 : index
    %37 = vector.load %arg1[%c0_33, %c36, %c0_34] : memref<1x326x4xbf16, #tpu.memory_space<vmem>>, vector<1x288x4xbf16>
    %38 = vector.shape_cast %37 : vector<1x288x4xbf16> to vector<288x4xbf16>
    %c6 = arith.constant 6 : index
    %c0_35 = arith.constant 0 : index
    %c0_36 = arith.constant 0 : index
    %39 = vector.load %arg2[%c6, %c0_35, %c0_36] : memref<9x4x128xbf16, #tpu.memory_space<vmem>>, vector<1x4x128xbf16>
    %40 = vector.shape_cast %39 : vector<1x4x128xbf16> to vector<4x128xbf16>
    %cst_37 = arith.constant dense<0.000000e+00> : vector<288x128xf32>
    %41 = tpu.matmul %38, %40, %cst_37 {dimension_numbers = #tpu.dot_dimension_numbers<[1], [0], [0], [1], [0, 0, 1, 1], [], []>} : vector<288x4xbf16>, vector<4x128xbf16>, vector<288x128xf32> -> vector<288x128xf32>
    %42 = arith.addf %36, %41 : vector<288x128xf32>
    %c0_38 = arith.constant 0 : index
    %c37 = arith.constant 37 : index
    %c0_39 = arith.constant 0 : index
    %43 = vector.load %arg1[%c0_38, %c37, %c0_39] : memref<1x326x4xbf16, #tpu.memory_space<vmem>>, vector<1x288x4xbf16>
    %44 = vector.shape_cast %43 : vector<1x288x4xbf16> to vector<288x4xbf16>
    %c7 = arith.constant 7 : index
    %c0_40 = arith.constant 0 : index
    %c0_41 = arith.constant 0 : index
    %45 = vector.load %arg2[%c7, %c0_40, %c0_41] : memref<9x4x128xbf16, #tpu.memory_space<vmem>>, vector<1x4x128xbf16>
    %46 = vector.shape_cast %45 : vector<1x4x128xbf16> to vector<4x128xbf16>
    %cst_42 = arith.constant dense<0.000000e+00> : vector<288x128xf32>
    %47 = tpu.matmul %44, %46, %cst_42 {dimension_numbers = #tpu.dot_dimension_numbers<[1], [0], [0], [1], [0, 0, 1, 1], [], []>} : vector<288x4xbf16>, vector<4x128xbf16>, vector<288x128xf32> -> vector<288x128xf32>
    %48 = arith.addf %42, %47 : vector<288x128xf32>
    %c0_43 = arith.constant 0 : index
    %c38 = arith.constant 38 : index
    %c0_44 = arith.constant 0 : index
    %49 = vector.load %arg1[%c0_43, %c38, %c0_44] : memref<1x326x4xbf16, #tpu.memory_space<vmem>>, vector<1x288x4xbf16>
    %50 = vector.shape_cast %49 : vector<1x288x4xbf16> to vector<288x4xbf16>
    %c8 = arith.constant 8 : index
    %c0_45 = arith.constant 0 : index
    %c0_46 = arith.constant 0 : index
    %51 = vector.load %arg2[%c8, %c0_45, %c0_46] : memref<9x4x128xbf16, #tpu.memory_space<vmem>>, vector<1x4x128xbf16>
    %52 = vector.shape_cast %51 : vector<1x4x128xbf16> to vector<4x128xbf16>
    %cst_47 = arith.constant dense<0.000000e+00> : vector<288x128xf32>
    %53 = tpu.matmul %50, %52, %cst_47 {dimension_numbers = #tpu.dot_dimension_numbers<[1], [0], [0], [1], [0, 0, 1, 1], [], []>} : vector<288x4xbf16>, vector<4x128xbf16>, vector<288x128xf32> -> vector<288x128xf32>
    %54 = arith.addf %48, %53 : vector<288x128xf32>
    %c0_48 = arith.constant 0 : index
    %c0_49 = arith.constant 0 : index
    %55 = vector.load %arg3[%c0_48, %c0_49] : memref<1x128xf32, #tpu.memory_space<vmem>>, vector<1x128xf32>
    %56 = vector.broadcast %55 : vector<1x128xf32> to vector<288x128xf32>
    %57 = arith.addf %54, %56 : vector<288x128xf32>
    %cst_50 = arith.constant 0.000000e+00 : f32
    %58 = vector.broadcast %cst_50 : f32 to vector<288x128xf32>
    %59 = arith.maximumf %57, %58 : vector<288x128xf32>
    %c0_51 = arith.constant 0 : index
    %c0_52 = arith.constant 0 : index
    %c0_53 = arith.constant 0 : index
    %60 = vector.load %arg4[%c0_51, %c0_52, %c0_53] : memref<1x288x128xf32, #tpu.memory_space<vmem>>, vector<1x288x128xf32>
    %61 = vector.shape_cast %60 : vector<1x288x128xf32> to vector<288x128xf32>
    %62 = vector.shape_cast %59 : vector<288x128xf32> to vector<1x288x128xf32>
    tpu.vector_store %arg4[%c0_51, %c0_52, %c0_53], %62 {strides = array<i32>} : memref<1x288x128xf32, #tpu.memory_space<vmem>>, vector<1x288x128xf32>,
    return
  }
  func.func @transform_0(%arg0: i32) -> (i32, i32, i32) {
    %c0_i32 = arith.constant 0 : i32
    %c0_i32_0 = arith.constant 0 : i32
    %c0_i32_1 = arith.constant 0 : i32
    return %arg0, %c0_i32, %c0_i32_0 : i32, i32, i32
  }
  func.func @transform_1(%arg0: i32) -> (i32, i32, i32) {
    %c0_i32 = arith.constant 0 : i32
    %c0_i32_0 = arith.constant 0 : i32
    %c0_i32_1 = arith.constant 0 : i32
    %c0_i32_2 = arith.constant 0 : i32
    return %c0_i32, %c0_i32_0, %c0_i32_1 : i32, i32, i32
  }
  func.func @transform_2(%arg0: i32) -> (i32, i32) {
    %c0_i32 = arith.constant 0 : i32
    %c0_i32_0 = arith.constant 0 : i32
    %c0_i32_1 = arith.constant 0 : i32
    return %c0_i32, %c0_i32_0 : i32, i32
  }
  func.func @transform_3(%arg0: i32) -> (i32, i32, i32) {
    %c0_i32 = arith.constant 0 : i32
    %c0_i32_0 = arith.constant 0 : i32
    %c0_i32_1 = arith.constant 0 : i32
    return %arg0, %c0_i32, %c0_i32_0 : i32, i32, i32
  }
}

</mosaic_0001>

<bundles_post_ra>
// kernel: tpu_custom_call.1
= control target key start
LH: loop header
LB: loop body
LE: loop exit
PB: predicated region body
PF: predicated region fallthrough
CT: control target
= control target key end

     0   :  { %8 = vsyncpa [#allocation3], 0  ;;  %s6078_s0 = inlined_call_operand.vmem [shape: bf16[2,326,4], index: 0, kind: input, shape index: {}]   ;;  %s6079_s1 = inlined_call_operand.vmem [shape: bf16[9,4,128], index: 1, kind: input, shape index: {}]   ;;  %s6080_s2 = inlined_call_operand.vmem [shape: f32[1,128], index: 2, kind: input, shape index: {}]   ;;  %s6081_s3 = inlined_call_operand.hbm [shape: f32[2,288,128], index: 3, kind: output, shape index: {}]  }
   0x1   :  { %10 = vsyncpa [#allocation3 + $0x1], 0  ;;  %s5067_s12 = smov 0   ;;  %s5069_s13 = smov 0  }
   0x2   :  { %s5071_s14 = smov 0   ;;  %s5073_s15 = smov 0  }
   0x3 LB: > { %s5088_s16 = sadd.s32 4294967295, %s5042_s15   ;;  %s3809_s17 = sadd.s32 4294967294, %s5042_s15   ;;  %s5042_s15 = sphi %s5073_s15, %s6087_s15   ;;  %s5038_s14 = sphi %s5071_s14, %s6086_s14   ;;  %s5034_s13 = sphi %s5069_s13, %s6085_s13   ;;  %s5030_s12 = sphi %s5067_s12, %s6084_s12  }
   0x4   : > { %s5092_s18 = sadd.s32 1, %s5042_s15   ;;  %s91_s19 = sadd.s32 1, %s5038_s14 }
   0x5   : > { %s88_s20 = ssub.s32 %s5042_s15, %s5092_s18  ;;  %p101_p0 = scmp.ne.s32.totalorder %s5038_s14, %s5034_s13 }
   0x6   : > { %p89_p1 = scmp.eq.s32.totalorder %s88_s20, 0  ;;  %p102_p2 = scmp.eq.s32.totalorder %s5088_s16, 1 }
   0x7   : > { %p107_p3 = scmp.ne.s32.totalorder %s5034_s13, %s5030_s12  ;;  %p108_p4 = scmp.eq.s32.totalorder %s3809_s17, 1 }
   0x8   : > { %s5103_s21 = scalar_select %p89_p1, %s5038_s14, %s91_s19  }
   0x9   : > { %p5105_p5 = por %p102_p2, %p101_p0  ;;  %p5109_p6 = por %p108_p4, %p107_p3 }
   0xa   : > { %p3812_p7 = scmp.ge.s32.totalorder %s5042_s15, 1  ;;  %p140_p8 = scmp.lt.s32.totalorder %s5042_s15, 3 }
   0xc   : > { %p141_p9 = pnand %p3812_p7, %p140_p8 }
   0xd   : > { %vm507_vm0 = vcmask (!%p141_p9), 1041408   ;;  %v3928_v0 = vld [vmem:[%s6079_s1 + $0x8] sm:$0x3] (!%p141_p9)  ;;  %v3814_v1 = vld [vmem:[%s6079_s1 + $0x2] sm:$0x3] (!%p141_p9)  ;;  %p164_p10 = scmp.lt.s32.totalorder (!%p141_p9), %s5088_s16, 1 }
   0xe   : > { %144 = sbr.rel (%p141_p9) target bundleno = 596 (0x254), region = 32  ;;  %4857 = vmatprep.subr.msk.bf16.mxu0 (!%p141_p9), %vm507_vm0, %v3928_v0  ;;  %4853 = vmatprep.subr.msk.bf16.mxu1 (!%p141_p9), %vm507_vm0, %v3814_v1  ;;  %v5125_v2 = vsel (!%p141_p9), %vm507_vm0, %v3928_v0, 0  ;;  %v509_v3 = vsel (!%p141_p9), %vm507_vm0, %v3814_v1, 0  ;;  %v3948_v4 = vld [vmem:[%s6079_s1 + $0xa] sm:$0x3] (!%p141_p9)  ;;  %vm452_vm2 = vcmask (!%p141_p9), 31744  }
   0xf   : > { %4374 = vmatpush3.bf16.msra.mxu0 (!%p141_p9), %v5125_v2  ;;  %4222 = vmatpush3.bf16.msra.mxu1 (!%p141_p9), %v509_v3  ;;  %v206_v5 = vld [vmem:[%s6079_s1] sm:$0x3] (!%p141_p9)  ;;  %vm303_vm1 = vsmask.f32 (!%p141_p9), 7424  ;;  %v5144_v6 = vsel (!%p141_p9), %vm507_vm0, %v3948_v4, 0  ;;  %vm2110_vm4 = vcmask (!%p141_p9), 1045504  }
  0x10   : > { %4859 = vmatprep.subr.msk.bf16.mxu0 (!%p141_p9), %vm507_vm0, %v3948_v4  ;;  %4854 = vmatprep.subr.msk.bf16.mxu1 (!%p141_p9), %vm507_vm0, %v206_v5  ;;  %vm1663_vm3 = vsmask.f32 (!%p141_p9), 6400  ;;  %v725_v12 = vsel (!%p141_p9), %vm507_vm0, %v206_v5, 0  ;;  %v5192_v39 = vld [vmem:[%s6079_s1 + $0x4] sm:$0x3] (!%p141_p9)  ;;  %vm910_vm5 = vcmask (!%p141_p9), 1046528  }
  0x11   : > { %v5226_v1 = vld [vmem:[%s6079_s1 + $0xc] sm:$0x3] (!%p141_p9)  ;;  %vm2863_vm6 = vsmask.f32 (!%p141_p9), 5376  ;;  %vm3310_vm7 = vcmask (!%p141_p9), 1044480   ;;  %s161_s4 = sand.u32 (!%p141_p9), 1, %s5034_s13  }
  0x12   : > { %s4863_s5 = smul.u32 (!%p141_p9), 288, %s161_s4  ;;  %s5044_s24 = smov (!%p141_p9), [#allocation2]  }
  0x13   : > { %s4984_s25 = sshll.u32 (!%p141_p9), %s5044_s24, 4  ;;  %s4985_s25 = int_to_ptr.vmem [resolvable:$false] %s4984_s25 }
  0x14   : > { %s5948_s8 = scalar_lea.vmem (!%p141_p9), [#allocation2], %s4863_s5  ;;  %s4986_s26 = scalar_lea.vmem (!%p141_p9), %s4985_s25, 9216 }
  0x15   : > { %s165_s28 = scalar_select %p164_p10, %s5088_s16, 1 }
  0x16   : > { %s3747_s10 = sshll.u32 %s5948_s8, 4  ;;  %s6030_s10 = int_to_ptr.vmem [resolvable:$true] %s3747_s10 }
  0x17   : > { %s4864_s6 = smul.u32 164, %s165_s28  ;;  %s4980_s20 = scalar_lea.vmem %s6030_s10, 4608 }
  0x18   : > { %p4981_p11 = scmp.ne.s32.totalorder %s6030_s10, %s4980_s20  ;;  %p4987_p0 = scmp.lt.s32.totalorder %s6030_s10, %s4985_s25 }
  0x19   : > { %s5141_s9 = scalar_lea.vmem %s6078_s0, %s4864_s6  ;;  %p4988_p1 = scmp.lt.s32.totalorder %s4986_s26, %s4980_s20 }
  0x1a   : > { %v170_v7 = vld [vmem:[%s5141_s9] sm:$0xf]  ;;  %v5148_v8 = vld [vmem:[%s5141_s9 + $0x4] sm:$0xf]  ;;  %v5154_v10 = vld [vmem:[%s5141_s9 + $0x8] sm:$0xff]   ;;  %p4982_p12 = pnand %p4981_p11, %p5105_p5 }
  0x1b   : > { %v5151_v9 = vcombine.low %v170_v7, %v5148_v8  ;;  %v1218_v11 = vld [vmem:[%s5141_s9 + $0x8] sm:$0xe]  ;;  %v5159_v13 = vld [vmem:[%s5141_s9 + $0xc] sm:$0xf]  ;;  %v312_v16 = vshll.u32 %v5154_v10, 16  ;;  %v316_v17 = vshrl.u32 %v5154_v10, 16  ;;  %p4989_p2 = por %p4988_p1, %p4987_p0 }
  0x1c   : > { %v5166_v18 = vld [vmem:[%s5141_s9 + $0x10] sm:$0xff]   ;;  %v5172_v20 = vcombine.low %v1218_v11, %v5159_v13  ;;  %v5180_v28 = vld [vmem:[%s5141_s9 + $0x18] sm:$0xff]   ;;  %v5186_v34 = vld [vmem:[%s5141_s9 + $0x20] sm:$0xff]   ;;  %p4983_p13 = pneg %p4982_p12 }
  0x1d   : > { %v305_v14 = vshrl.u32 %v5151_v9, 16  ;;  %v307_v15 = vshll.u32 %v5151_v9, 16  ;;  %v5169_v19 = vld [vmem:[%s5141_s9 + $0x10] sm:$0xff]   ;;  %v314_v22 = vrot.slane %v312_v16, 1  ;;  %v1673_v23 = vshrl.u32 %v5166_v18, 16  ;;  %v5183_v33 = vld [vmem:[%s5141_s9 + $0x18] sm:$0xff]  }
  0x1e   : > { %v1676_v24 = vshll.u32 %v5166_v18, 16  ;;  %v1665_v25 = vshrl.u32 %v5172_v20, 16  ;;  %v1668_v26 = vshll.u32 %v5172_v20, 16  ;;  %v320_v27 = vshll.u32 %v5169_v19, 16  ;;  %v5201_v48 = vld [vmem:[%s5141_s9 + $0x20] sm:$0xff]   ;;  %v5204_v49 = vld [vmem:[%s5141_s9 + $0x28] sm:$0xff]   ;;  %p4990_p3 = pnand %p4989_p2, %p4983_p13 }
  0x1f   : > { %v309_v21 = vrot.slane %v307_v15, 1  ;;  %v318_v30 = vor.u32 %v316_v17, %v314_v22  ;;  %v1675_v31 = vrot.slane %v1673_v23, 1  ;;  %v1682_v38 = vshrl.u32 %v5180_v28, 16  ;;  %v5210_v54 = vld [vmem:[%s5141_s9 + $0x28] sm:$0xff]   ;;  %v5216_v59 = vld [vmem:[%s5141_s9 + $0x30] sm:$0xff]   ;;  %v5240_v23 = vld [vmem:[%s5141_s9 + $0x38] sm:$0xff]  }
  0x20   : > { %v1678_v32 = vrot.slane %v1676_v24, 2  ;;  %v1667_v35 = vrot.slane %v1665_v25, 1  ;;  %v1670_v36 = vrot.slane %v1668_v26, 2  ;;  %v322_v37 = vrot.slane %v320_v27, 1  ;;  %v5221_v0 = vld [vmem:[%s5141_s9 + $0x30] sm:$0xff]  }
  0x21   : > { %v310_v29 = vor.u32 %v309_v21, %v305_v14  ;;  %v1685_v42 = vshll.u32 %v5180_v28, 16  ;;  %v324_v43 = vshrl.u32 %v5169_v19, 16  ;;  %v1684_v46 = vrot.slane %v1682_v38, 1 }
  0x22   : > { %v1679_v41 = vor.u32 %v1678_v32, %v1675_v31  ;;  %v1671_v44 = vor.u32 %v1670_v36, %v1667_v35  ;;  %v323_v45 = vsel %vm303_vm1, %v318_v30, %v322_v37  ;;  %v328_v47 = vshll.u32 %v5183_v33, 16  ;;  %v5249_v35 = vld [vmem:[%s5141_s9 + $0x38] sm:$0xff]  }
  0x23   : > { %v315_v40 = vsel %vm303_vm1, %v310_v29, %v314_v22  ;;  %v1687_v50 = vrot.slane %v1685_v42, 2  ;;  %v326_v51 = vor.u32 %v324_v43, %v322_v37  ;;  %v1691_v52 = vshrl.u32 %v5186_v34, 16 }
  0x24   : > { %4223 = vmatprep.mubr.msk.bf16.mxu1 %vm452_vm2, %v315_v40  ;;  %v1694_v53 = vshll.u32 %v5186_v34, 16  ;;  %v1680_v55 = vsel %vm1663_vm3, %v1671_v44, %v1679_v41  ;;  %v330_v56 = vrot.slane %v328_v47, 1  ;;  %v332_v57 = vshrl.u32 %v5183_v33, 16  ;;  %v5260_v44 = vld [vmem:[%s5141_s9 + $0x40] sm:$0xff]  }
  0x25   : > { %4224 = vmatmul.mubr.msk.bf16.vlgmr.msra.gmra.mrb[0].mxu1 %vm452_vm2, %v323_v45  ;;  %v336_v58 = vshll.u32 %v5201_v48, 16  ;;  %4375 = vmatprep.mubr.msk.bf16.mxu0 %vm452_vm2, %v1680_v55  ;;  %v1688_v60 = vor.u32 %v1687_v50, %v1684_v46  ;;  %v1693_v61 = vrot.slane %v1691_v52, 1  ;;  %v1700_v63 = vshrl.u32 %v5204_v49, 16 }
  0x26   : > { %4260 = vmatpush3.bf16.msra.mxu1 %v725_v12  ;;  %v1696_v62 = vrot.slane %v1694_v53, 2  ;;  %v331_v3 = vsel %vm303_vm1, %v326_v51, %v330_v56  ;;  %v334_v4 = vor.u32 %v332_v57, %v330_v56  ;;  %v1703_v7 = vshll.u32 %v5204_v49, 16  ;;  %v5265_v51 = vld [vmem:[%s5141_s9 + $0x40] sm:$0xff]  }
  0x27   : > { %4855 = vmatprep.subr.msk.bf16.mxu1 %vm507_vm0, %v5192_v39  ;;  %v338_v5 = vrot.slane %v336_v58, 1  ;;  %v1689_v11 = vsel %vm1663_vm3, %v1679_v41, %v1688_v60  ;;  %4227 = vmatprep.mubr.msk.bf16.mxu1 %vm452_vm2, %v331_v3  ;;  %v1702_v14 = vrot.slane %v1700_v63, 1  ;;  %v340_v15 = vshrl.u32 %v5201_v48, 16  ;;  %v5276_v63 = vld [vmem:[%s5141_s9 + $0x48] sm:$0xff]  }
  0x28   : > { %v1697_v12 = vor.u32 %v1696_v62, %v1693_v61  ;;  %4376 = vmatmul.mubr.msk.bf16.vlgmr.msra.gmra.mrb[0].mxu0 %vm452_vm2, %v1689_v11  ;;  %v1705_v17 = vrot.slane %v1703_v7, 2  ;;  %v344_v21 = vshll.u32 %v5210_v54, 16  ;;  %v1709_v22 = vshrl.u32 %v5216_v59, 16  ;;  %v5273_v62 = vld [vmem:[%s5141_s9 + $0x48] sm:$0xff]  }
  0x29   : > { %v339_v16 = vsel %vm303_vm1, %v334_v4, %v338_v5  ;;  %4412 = vmatpush3.bf16.msra.mxu0 %v5144_v6  ;;  %v342_v25 = vor.u32 %v340_v15, %v338_v5  ;;  %v1712_v26 = vshll.u32 %v5216_v59, 16  ;;  %v348_v27 = vshrl.u32 %v5210_v54, 16 }
  0x2a   : > { %v1698_v24 = vsel %vm1663_vm3, %v1688_v60, %v1697_v12  ;;  %v1706_v29 = vor.u32 %v1705_v17, %v1702_v14  ;;  %v346_v30 = vrot.slane %v344_v21, 1  ;;  %v1711_v31 = vrot.slane %v1709_v22, 1  ;;  %4860 = vmatprep.subr.msk.bf16.mxu0 %vm507_vm0, %v5226_v1  ;;  %v5285_v14 = vld [vmem:[%s5141_s9 + $0x50] sm:$0xff]  }
  0x2b   : > { %4379 = vmatprep.mubr.msk.bf16.mxu0 %vm452_vm2, %v1698_v24  ;;  %v352_v32 = vshll.u32 %v5221_v0, 16  ;;  %v1714_v6 = vrot.slane %v1712_v26, 2  ;;  %v1718_v36 = vshrl.u32 %v5240_v23, 16  ;;  %v1721_v37 = vshll.u32 %v5240_v23, 16 }
  0x2c   : > { %v356_v38 = vshrl.u32 %v5221_v0, 16  ;;  %v1707_v40 = vsel %vm1663_vm3, %v1697_v12, %v1706_v29  ;;  %v347_v41 = vsel %vm303_vm1, %v342_v25, %v346_v30  ;;  %v350_v42 = vor.u32 %v348_v27, %v346_v30  ;;  %v5293_v25 = vld [vmem:[%s5141_s9 + $0x50] sm:$0xff]  }
  0x2d   : > { %4228 = vmatmul.mubr.msk.bf16.gmra.mrb[4].mxu1 %vm452_vm2, %v339_v16  ;;  %v354_v43 = vrot.slane %v352_v32, 1  ;;  %v1715_v45 = vor.u32 %v1714_v6, %v1711_v31  ;;  %v1720_v46 = vrot.slane %v1718_v36, 1  ;;  %v1723_v47 = vrot.slane %v1721_v37, 2 }
  0x2e   : > { %4231 = vmatprep.mubr.msk.bf16.mxu1 %vm452_vm2, %v347_v41  ;;  %v360_v50 = vshll.u32 %v5249_v35, 16  ;;  %v1727_v55 = vshrl.u32 %v5260_v44, 16  ;;  %v1730_v56 = vshll.u32 %v5260_v44, 16  ;;  %v364_v61 = vshrl.u32 %v5249_v35, 16  ;;  %v5303_v41 = vld [vmem:[%s5141_s9 + $0x58] sm:$0xff]  }
  0x2f   : > { %v355_v52 = vsel %vm303_vm1, %v350_v42, %v354_v43  ;;  %v358_v53 = vor.u32 %v356_v38, %v354_v43  ;;  %v1716_v57 = vsel %vm1663_vm3, %v1706_v29, %v1715_v45  ;;  %v1724_v58 = vor.u32 %v1723_v47, %v1720_v46  ;;  %v5298_v29 = vld [vmem:[%s5141_s9 + $0x58] sm:$0xff]  }
  0x30   : > { %v362_v60 = vrot.slane %v360_v50, 1  ;;  %4380 = vmatmul.mubr.msk.bf16.gmra.mrb[4].mxu0 %vm452_vm2, %v1707_v40  ;;  %v1729_v3 = vrot.slane %v1727_v55, 1  ;;  %v1732_v4 = vrot.slane %v1730_v56, 2  ;;  %v368_v5 = vshll.u32 %v5265_v51, 16 }
  0x31   : > { %v372_v7 = vshrl.u32 %v5265_v51, 16  ;;  %4383 = vmatprep.mubr.msk.bf16.mxu0 %vm452_vm2, %v1716_v57  ;;  %v1736_v12 = vshrl.u32 %v5273_v62, 16  ;;  %v1739_v16 = vshll.u32 %v5273_v62, 16  ;;  %v376_v17 = vshll.u32 %v5276_v63, 16  ;;  %v2104_v57 = vld [vmem:[%s5141_s9 + $0x8] sm:$0xc] }
  0x32   : > { %v363_v11 = vsel %vm303_vm1, %v358_v53, %v362_v60  ;;  %v1733_v15 = vor.u32 %v1732_v4, %v1729_v3  ;;  %v370_v21 = vrot.slane %v368_v5, 1  ;;  %v1745_v22 = vshrl.u32 %v5285_v14, 16 }
  0x33   : > { %v1748_v24 = vshll.u32 %v5285_v14, 16  ;;  %v1725_v26 = vsel %vm1663_vm3, %v1715_v45, %v1724_v58  ;;  %v366_v27 = vor.u32 %v364_v61, %v362_v60  ;;  %v1738_v30 = vrot.slane %v1736_v12, 1 }
  0x34   : > { %v1741_v31 = vrot.slane %v1739_v16, 2  ;;  %v374_v32 = vor.u32 %v372_v7, %v370_v21  ;;  %v378_v6 = vrot.slane %v376_v17, 1  ;;  %v1734_v36 = vsel %vm1663_vm3, %v1724_v58, %v1733_v15  ;;  %v5317_v58 = vld [vmem:[%s5141_s9 + $0x60] sm:$0xff]  }
  0x35   : > { %4232 = vmatmul.mubr.msk.bf16.gmra.mrb[8].mxu1 %vm452_vm2, %v355_v52  ;;  %v1747_v37 = vrot.slane %v1745_v22, 1  ;;  %v1750_v38 = vrot.slane %v1748_v24, 2  ;;  %v384_v40 = vshll.u32 %v5293_v25, 16  ;;  %v371_v42 = vsel %vm303_vm1, %v366_v27, %v370_v21 }
  0x36   : > { %4235 = vmatprep.mubr.msk.bf16.mxu1 %vm452_vm2, %v363_v11  ;;  %v380_v43 = vshrl.u32 %v5276_v63, 16  ;;  %v1754_v45 = vshrl.u32 %v5298_v29, 16  ;;  %v1757_v46 = vshll.u32 %v5298_v29, 16  ;;  %v1742_v47 = vor.u32 %v1741_v31, %v1738_v30  ;;  %v5322_v11 = vld [vmem:[%s5141_s9 + $0x68] sm:$0xff]  }
  0x37   : > { %v379_v50 = vsel %vm303_vm1, %v374_v32, %v378_v6  ;;  %v388_v52 = vshrl.u32 %v5293_v25, 16  ;;  %v392_v53 = vshll.u32 %v5303_v41, 16  ;;  %v1751_v55 = vor.u32 %v1750_v38, %v1747_v37  ;;  %v5339_v32 = vld [vmem:[%s5141_s9 + $0x70] sm:$0xff]  }
  0x38   : > { %4384 = vmatmul.mubr.msk.bf16.gmra.mrb[8].mxu0 %vm452_vm2, %v1725_v26  ;;  %v386_v56 = vrot.slane %v384_v40, 1  ;;  %v382_v60 = vor.u32 %v380_v43, %v378_v6  ;;  %v1756_v61 = vrot.slane %v1754_v45, 1  ;;  %v1759_v3 = vrot.slane %v1757_v46, 2  ;;  %v5345_v40 = vld [vmem:[%s5141_s9 + $0x78] sm:$0xff]  }
  0x39   : > { %4387 = vmatprep.mubr.msk.bf16.mxu0 %vm452_vm2, %v1734_v36  ;;  %v1743_v4 = vsel %vm1663_vm3, %v1733_v15, %v1742_v47  ;;  %v394_v7 = vrot.slane %v392_v53, 1  ;;  %v1752_v12 = vsel %vm1663_vm3, %v1742_v47, %v1751_v55  ;;  %v3949_v16 = vcombine.low %v2104_v57, %v5159_v13 }
  0x3a   : > { %v390_v5 = vor.u32 %v388_v52, %v386_v56  ;;  %v400_v17 = vshll.u32 %v5317_v58, 16  ;;  %v387_v21 = vsel %vm303_vm1, %v382_v60, %v386_v56  ;;  %v396_v22 = vshrl.u32 %v5303_v41, 16  ;;  %v5360_v56 = vld [vmem:[%s5141_s9 + $0x80] sm:$0xff]  }
  0x3b   : > { %v5331_v15 = vor.u32 %v1759_v3, %v1756_v61  ;;  %v404_v26 = vshrl.u32 %v5317_v58, 16  ;;  %v408_v27 = vshll.u32 %v5322_v11, 16  ;;  %v2111_v13 = vrot.slane %v3949_v16, 2 }
  0x3c   : > { %v395_v24 = vsel %vm303_vm1, %v390_v5, %v394_v7  ;;  %v2112_v30 = vrot.slane %v5166_v18, 2  ;;  %v402_v31 = vrot.slane %v400_v17, 1  ;;  %v398_v6 = vor.u32 %v396_v22, %v394_v7 }
  0x3d   : > { %4236 = vmatmul.mubr.msk.bf16.gmra.mrb[12].mxu1 %vm452_vm2, %v371_v42  ;;  %v1761_v36 = vsel %vm1663_vm3, %v1751_v55, %v5331_v15  ;;  %v410_v38 = vrot.slane %v408_v27, 1  ;;  %v416_v18 = vshll.u32 %v5339_v32, 16  ;;  %v2114_v45 = vrot.slane %v5180_v28, 2  ;;  %v5390_v27 = vld [vmem:[%s5141_s9 + $0x90] ss:$0 sps:$4 sm:$0x11]  }
  0x3e   : > { %4239 = vmatprep.mubr.msk.bf16.mxu1 %vm452_vm2, %v379_v50  ;;  %v406_v37 = vor.u32 %v404_v26, %v402_v31  ;;  %v2113_v42 = vsel %vm2110_vm4, %v2111_v13, %v2112_v30  ;;  %v403_v43 = vsel %vm303_vm1, %v398_v6, %v402_v31  ;;  %v412_v46 = vshrl.u32 %v5322_v11, 16 }
  0x3f   : > { %v420_v50 = vshrl.u32 %v5339_v32, 16  ;;  %v424_v52 = vshll.u32 %v5345_v40, 16  ;;  %v2116_v53 = vrot.slane %v5186_v34, 2  ;;  %v418_v55 = vrot.slane %v416_v18, 1  ;;  %v5373_v34 = vld [vmem:[%s6079_s1 + $0xe] sm:$0x3] }
  0x40   : > { %4388 = vmatmul.mubr.msk.bf16.gmra.mrb[12].mxu0 %vm452_vm2, %v1743_v4  ;;  %v411_v47 = vsel %vm303_vm1, %v406_v37, %v410_v38  ;;  %v2642_v28 = vsel %vm507_vm0, %v5226_v1, 0  ;;  %v414_v57 = vor.u32 %v412_v46, %v410_v38  ;;  %v2115_v60 = vsel %vm2110_vm4, %v2112_v30, %v2114_v45  ;;  %v5367_v4 = vld [vmem:[%s5141_s9 + $0x88] sm:$0xff]  }
  0x41   : > { %4391 = vmatprep.mubr.msk.bf16.mxu0 %vm452_vm2, %v1752_v12  ;;  %v422_v61 = vor.u32 %v420_v50, %v418_v55  ;;  %v426_v3 = vrot.slane %v424_v52, 1  ;;  %v2117_v5 = vsel %vm2110_vm4, %v2114_v45, %v2116_v53  ;;  %v432_v7 = vshll.u32 %v5360_v56, 16 }
  0x42   : > { %v419_v1 = vsel %vm303_vm1, %v414_v57, %v418_v55  ;;  %v2118_v12 = vrot.slane %v5204_v49, 2  ;;  %v428_v16 = vshrl.u32 %v5345_v40, 16  ;;  %v440_v22 = vshll.u32 %v5367_v4, 16  ;;  %v5417_v55 = vld [vmem:[%s5141_s9 + $0x60] sm:$0xff]   ;;  %v5436_v57 = vld [vmem:[%s5141_s9 + $0x68] sm:$0xff]  }
  0x43   : > { %v427_v17 = vsel %vm303_vm1, %v422_v61, %v426_v3  ;;  %v434_v26 = vrot.slane %v432_v7, 1  ;;  %v448_v37 = vshll.u32 %v5390_v27, 16  ;;  %v2122_v38 = vrot.slane %v5240_v23, 2  ;;  %v5454_v7 = vld [vmem:[%s5141_s9 + $0x78] sm:$0xff]  }
  0x44   : > { %v430_v49 = vor.u32 %v428_v16, %v426_v3  ;;  %v2119_v13 = vsel %vm2110_vm4, %v2116_v53, %v2118_v12  ;;  %v442_v31 = vrot.slane %v440_v22, 1  ;;  %v2124_v18 = vrot.slane %v5260_v44, 2  ;;  %v5470_v22 = vld [vmem:[%s5141_s9 + $0x88] sm:$0xff]  }
  0x45   : > { %4240 = vmatmul.mubr.msk.bf16.gmra.mrb[16].mxu1 %vm452_vm2, %v387_v21  ;;  %v436_v21 = vshrl.u32 %v5360_v56, 16  ;;  %v450_v45 = vrot.slane %v448_v37, 1  ;;  %v2126_v23 = vrot.slane %v5273_v62, 2  ;;  %v2128_v44 = vrot.slane %v5285_v14, 2 }
  0x46   : > { %4243 = vmatprep.mubr.msk.bf16.mxu1 %vm452_vm2, %v395_v24  ;;  %v2120_v24 = vrot.slane %v5216_v59, 2  ;;  %v435_v59 = vsel %vm303_vm1, %v430_v49, %v434_v26  ;;  %v2130_v62 = vrot.slane %v5298_v29, 2  ;;  %v1003_v14 = vsel %vm507_vm0, %v5192_v39, 0 }
  0x47   : > { %v438_v30 = vor.u32 %v436_v21, %v434_v26  ;;  %v2127_v52 = vsel %vm2110_vm4, %v2124_v18, %v2126_v23  ;;  %v2129_v53 = vsel %vm2110_vm4, %v2126_v23, %v2128_v44  ;;  %v2134_v61 = vrot.slane %v5436_v57, 2  ;;  %v5474_v26 = vld [vmem:[%s5141_s9 + $0x90] sm:$0xff]  }
  0x48   : > { %4392 = vmatmul.mubr.msk.bf16.gmra.mrb[16].mxu0 %vm452_vm2, %v1761_v36  ;;  %v2121_v6 = vsel %vm2110_vm4, %v2118_v12, %v2120_v24  ;;  %v444_v36 = vshrl.u32 %v5367_v4, 16  ;;  %v2123_v46 = vsel %vm2110_vm4, %v2120_v24, %v2122_v38  ;;  %v2131_v29 = vsel %vm2110_vm4, %v2128_v44, %v2130_v62  ;;  %v5458_v12 = vld [vmem:[%s5141_s9 + $0x80] sm:$0xff]  }
  0x49   : > { %4413 = vmatprep.mubr.msk.bf16.mxu0 %vm452_vm2, %v2113_v42  ;;  %v443_v42 = vsel %vm303_vm1, %v438_v30, %v442_v31  ;;  %v2138_v16 = vrot.slane %v5454_v7, 2  ;;  %v2142_v49 = vrot.slane %v5470_v22, 2  ;;  %v2418_v30 = vld [vmem:[%s5141_s9 + $0x10] sm:$0xc] }
  0x4d   : > { %4244 = vmatmul.mubr.msk.bf16.gmra.mrb[20].mxu1 %vm452_vm2, %v403_v43  ;;  %v446_v43 = vor.u32 %v444_v36, %v442_v31  ;;  %v5484_v31 = vld [vmem:[%s5141_s9 + $0x14] sm:$0xf] }
  0x4e   : > { %4247 = vmatprep.mubr.msk.bf16.mxu1 %vm452_vm2, %v411_v47  ;;  %v2125_v47 = vsel %vm2110_vm4, %v2122_v38, %v2124_v18  ;;  %v5494_v37 = vcombine.low %v2418_v30, %v5484_v31  ;;  %v5497_v38 = vld [vmem:[%s5141_s9 + $0x18] sm:$0xff]  }
  0x4f   : > { %v451_v50 = vsel %vm303_vm1, %v446_v43, %v450_v45  ;;  %v2551_v43 = vrot.slane %v5497_v38, 2 }
  0x50   : > { %4414 = vmatmul.mubr.msk.bf16.vlgmr.msra.gmra.mrb[0].mxu0 %vm452_vm2, %v2115_v60  ;;  %v5442_v60 = vld [vmem:[%s5141_s9 + $0x70] sm:$0xff]   ;;  %v2550_v18 = vrot.slane %v5494_v37, 2 }
  0x51   : > { %4450 = vmatpush3.bf16.msra.mxu0 %v2642_v28  ;;  %4417 = vmatprep.mubr.msk.bf16.mxu0 %vm452_vm2, %v2117_v5  ;;  %v2132_v28 = vrot.slane %v5417_v55, 2  ;;  %v2136_v3 = vrot.slane %v5442_v60, 2 }
  0x52   : > { %4861 = vmatprep.subr.msk.bf16.mxu0 %vm507_vm0, %v5373_v34 }
  0x53   : > { %v2133_v39 = vsel %vm2110_vm4, %v2130_v62, %v2132_v28  ;;  %v2135_v5 = vsel %vm2110_vm4, %v2132_v28, %v2134_v61  ;;  %v2139_v21 = vsel %vm2110_vm4, %v2136_v3, %v2138_v16  ;;  %v3089_v62 = vsel %vm507_vm0, %v5373_v34, 0  ;;  %v5532_v28 = vld [vmem:[%s5141_s9 + $0x38] sm:$0xff]  }
  0x55   : > { %4248 = vmatmul.mubr.msk.bf16.gmra.mrb[24].mxu1 %vm452_vm2, %v419_v1  ;;  %v2137_v1 = vsel %vm2110_vm4, %v2134_v61, %v2136_v3  ;;  %v2559_v61 = vrot.slane %v5532_v28, 2  ;;  %v5551_v3 = vld [vmem:[%s5141_s9 + $0x40] sm:$0xff]  }
  0x56   : > { %4251 = vmatprep.mubr.msk.bf16.mxu1 %vm452_vm2, %v427_v17  ;;  %v2140_v17 = vrot.slane %v5458_v12, 2 }
  0x58   : > { %4418 = vmatmul.mubr.msk.bf16.gmra.mrb[4].mxu0 %vm452_vm2, %v2119_v13  ;;  %v2141_v24 = vsel %vm2110_vm4, %v2138_v16, %v2140_v17  ;;  %v2144_v13 = vrot.slane %v5474_v26, 2  ;;  %v904_v16 = vld [vmem:[%s5141_s9] sm:$0xe] }
  0x59   : > { %4421 = vmatprep.mubr.msk.bf16.mxu0 %vm452_vm2, %v2121_v6  ;;  %v2143_v6 = vsel %vm2110_vm4, %v2140_v17, %v2142_v49  ;;  %v2561_v17 = vrot.slane %v5551_v3, 2 }
  0x5a   : > { %v2145_v36 = vsel %vm2110_vm4, %v2142_v49, %v2144_v13 }
  0x5b   : > { %v2562_v49 = vsel %vm2110_vm4, %v2559_v61, %v2561_v17 }
  0x5d   : > { %4252 = vmatmul.mubr.msk.bf16.gmra.mrb[28].mxu1 %vm452_vm2, %v435_v59  ;;  %v5490_v59 = vld [vmem:[%s5141_s9 + $0x98] ss:$0 sps:$4 sm:$0x33]  }
  0x5e   : > { %4255 = vmatprep.mubr.msk.bf16.mxu1 %vm452_vm2, %v443_v42  ;;  %v2146_v42 = vrot.slane %v5490_v59, 2 }
  0x60   : > { %4422 = vmatmul.mubr.msk.bf16.gmra.mrb[8].mxu0 %vm452_vm2, %v2123_v46  ;;  %v2147_v45 = vsel %vm2110_vm4, %v2144_v13, %v2146_v42  ;;  %v5510_v46 = vld [vmem:[%s5141_s9 + $0x20] sm:$0xff]   ;;  %v5569_v13 = vld [vmem:[%s5141_s9 + $0x50] sm:$0xff]  }
  0x61   : > { %4425 = vmatprep.mubr.msk.bf16.mxu0 %vm452_vm2, %v2125_v47  ;;  %v2552_v47 = vsel %vm2110_vm4, %v2550_v18, %v2551_v43  ;;  %v2553_v23 = vrot.slane %v5510_v46, 2  ;;  %v2565_v42 = vrot.slane %v5569_v13, 2 }
  0x65   : > { %4256 = vmatmul.mubr.msk.bf16.gmra.mrb[32].mxu1 %vm452_vm2, %v451_v50  ;;  %v5514_v50 = vld [vmem:[%s5141_s9 + $0x28] sm:$0xff]  }
  0x66   : > { %4261 = vmatprep.mubr.msk.bf16.mxu1 %vm452_vm2, %v5151_v9  ;;  %v5428_v9 = vld [vmem:[%s6079_s1 + $0x6] sm:$0x3]  ;;  %v2555_v44 = vrot.slane %v5514_v50, 2 }
  0x68   : > { %4426 = vmatmul.mubr.msk.bf16.gmra.mrb[12].mxu0 %vm452_vm2, %v2127_v52  ;;  %v2554_v52 = vsel %vm2110_vm4, %v2551_v43, %v2553_v23 }
  0x69   : > { %4429 = vmatprep.mubr.msk.bf16.mxu0 %vm452_vm2, %v2129_v53  ;;  %v5526_v53 = vld [vmem:[%s5141_s9 + $0x30] sm:$0xff]  }
  0x6d   : > { %4262 = vmatmul.mubr.msk.bf16.vlgmr.msra.gmra.mrb[0].mxu1 %vm452_vm2, %v5154_v10 }
  0x6e   : > { %4265 = vmatprep.mubr.msk.bf16.mxu1 %vm452_vm2, %v5169_v19  ;;  %4298 = vmatpush3.bf16.msra.mxu1 %v1003_v14  ;;  %v2556_v14 = vsel %vm2110_vm4, %v2553_v23, %v2555_v44  ;;  %v916_v23 = vrot.slane %v5183_v33, 1 }
  0x6f   : > { %4856 = vmatprep.subr.msk.bf16.mxu1 %vm507_vm0, %v5428_v9 }
  0x70   : > { %4430 = vmatmul.mubr.msk.bf16.gmra.mrb[16].mxu0 %vm452_vm2, %v2131_v29  ;;  %v5537_v29 = vld [vmem:[%s6079_s1 + $0x10] sm:$0x3] }
  0x71   : > { %4433 = vmatprep.mubr.msk.bf16.mxu0 %vm452_vm2, %v2133_v39  ;;  %v2557_v39 = vrot.slane %v5526_v53, 2 }
  0x73   : > { %v2558_v34 = vsel %vm2110_vm4, %v2555_v44, %v2557_v39 }
  0x75   : > { %4266 = vmatmul.mubr.msk.bf16.gmra.mrb[4].mxu1 %vm452_vm2, %v5183_v33 }
  0x76   : > { %4269 = vmatprep.mubr.msk.bf16.mxu1 %vm452_vm2, %v5201_v48 }
  0x78   : > { %4434 = vmatmul.mubr.msk.bf16.gmra.mrb[20].mxu0 %vm452_vm2, %v2135_v5  ;;  %v2560_v5 = vsel %vm2110_vm4, %v2557_v39, %v2559_v61  ;;  %v1442_v39 = vsel %vm507_vm0, %v5428_v9, 0  ;;  %v918_v61 = vrot.slane %v5201_v48, 1  ;;  %v4969_v9 = vld [vmem:[%s6079_s1 + $0x8] sm:$0x3] }
  0x79   : > { %4437 = vmatprep.mubr.msk.bf16.mxu0 %vm452_vm2, %v2137_v1  ;;  %v5555_v1 = vld [vmem:[%s5141_s9 + $0x48] sm:$0xff]  }
  0x7a   : > { %v919_v48 = vsel %vm910_vm5, %v916_v23, %v918_v61 }
  0x7d   : > { %4270 = vmatmul.mubr.msk.bf16.gmra.mrb[8].mxu1 %vm452_vm2, %v5210_v54 }
  0x7e   : > { %4273 = vmatprep.mubr.msk.bf16.mxu1 %vm452_vm2, %v5221_v0 }
  0x80   : > { %4438 = vmatmul.mubr.msk.bf16.gmra.mrb[24].mxu0 %vm452_vm2, %v2139_v21  ;;  %v3871_v21 = vcombine.low %v904_v16, %v5148_v8  ;;  %v5574_v8 = vld [vmem:[%s5141_s9 + $0x58] sm:$0xff]   ;;  %v920_v16 = vrot.slane %v5210_v54, 1 }
  0x81   : > { %4441 = vmatprep.mubr.msk.bf16.mxu0 %vm452_vm2, %v2141_v24  ;;  %v2563_v24 = vrot.slane %v5555_v1, 2  ;;  %v2567_v43 = vrot.slane %v5574_v8, 2 }
  0x82   : > { %v911_v30 = vrot.slane %v3871_v21, 1  ;;  %v5616_v21 = vld [vmem:[%s5141_s9 + $0x78] sm:$0xff]   ;;  %v921_v54 = vsel %vm910_vm5, %v918_v61, %v920_v16 }
  0x83   : > { %v2568_v44 = vsel %vm2110_vm4, %v2565_v42, %v2567_v43 }
  0x85   : > { %4274 = vmatmul.mubr.msk.bf16.gmra.mrb[12].mxu1 %vm452_vm2, %v5249_v35 }
  0x86   : > { %4277 = vmatprep.mubr.msk.bf16.mxu1 %vm452_vm2, %v5265_v51 }
  0x88   : > { %4442 = vmatmul.mubr.msk.bf16.gmra.mrb[28].mxu0 %vm452_vm2, %v2143_v6  ;;  %v912_v6 = vrot.slane %v5154_v10, 1  ;;  %v914_v10 = vrot.slane %v5169_v19, 1 }
  0x89   : > { %4445 = vmatprep.mubr.msk.bf16.mxu0 %vm452_vm2, %v2145_v36  ;;  %v2564_v36 = vsel %vm2110_vm4, %v2561_v17, %v2563_v24 }
  0x8a   : > { %v913_v18 = vsel %vm910_vm5, %v911_v30, %v912_v6  ;;  %v922_v30 = vrot.slane %v5221_v0, 1 }
  0x8d   : > { %4278 = vmatmul.mubr.msk.bf16.gmra.mrb[16].mxu1 %vm452_vm2, %v5276_v63 }
  0x8e   : > { %4281 = vmatprep.mubr.msk.bf16.mxu1 %vm452_vm2, %v5293_v25 }
  0x90   : > { %4446 = vmatmul.mubr.msk.bf16.gmra.mrb[32].mxu0 %vm452_vm2, %v2147_v45  ;;  %v2566_v45 = vsel %vm2110_vm4, %v2563_v24, %v2565_v42  ;;  %v924_v42 = vrot.slane %v5249_v35, 1  ;;  %v926_v35 = vrot.slane %v5265_v51, 1 }
  0x91   : > { %4451 = vmatprep.mubr.msk.bf16.mxu0 %vm452_vm2, %v2552_v47  ;;  %v5587_v47 = vld [vmem:[%s5141_s9 + $0x60] sm:$0xff]  }
  0x92   : > { %v2569_v19 = vrot.slane %v5587_v47, 2 }
  0x95   : > { %4282 = vmatmul.mubr.msk.bf16.gmra.mrb[20].mxu1 %vm452_vm2, %v5303_v41 }
  0x96   : > { %4285 = vmatprep.mubr.msk.bf16.mxu1 %vm452_vm2, %v5317_v58 }
  0x98   : > { %4452 = vmatmul.mubr.msk.bf16.vlgmr.msra.gmra.mrb[0].mxu0 %vm452_vm2, %v2554_v52  ;;  %v5592_v52 = vld [vmem:[%s5141_s9 + $0x68] sm:$0xff]  }
  0x99   : > { %4488 = vmatpush3.bf16.msra.mxu0 %v3089_v62  ;;  %4455 = vmatprep.mubr.msk.bf16.mxu0 %vm452_vm2, %v2556_v14  ;;  %v915_v62 = vsel %vm910_vm5, %v912_v6, %v914_v10  ;;  %v917_v14 = vsel %vm910_vm5, %v914_v10, %v916_v23  ;;  %v2571_v33 = vrot.slane %v5592_v52, 2  ;;  %v923_v10 = vsel %vm910_vm5, %v920_v16, %v922_v30 }
  0x9a   : > { %4862 = vmatprep.subr.msk.bf16.mxu0 %vm507_vm0, %v5537_v29  ;;  %v2865_v16 = vshrl.u32 %v5494_v37, 16 }
  0x9b   : > { %v2572_v17 = vsel %vm2110_vm4, %v2569_v19, %v2571_v33 }
  0x9d   : > { %4286 = vmatmul.mubr.msk.bf16.gmra.mrb[24].mxu1 %vm452_vm2, %v5322_v11 }
  0x9e   : > { %4289 = vmatprep.mubr.msk.bf16.mxu1 %vm452_vm2, %v5339_v32 }
  0xa0   : > { %4456 = vmatmul.mubr.msk.bf16.gmra.mrb[4].mxu0 %vm452_vm2, %v2558_v34  ;;  %v2570_v34 = vsel %vm2110_vm4, %v2567_v43, %v2569_v19  ;;  %v5634_v43 = vld [vmem:[%s5141_s9 + $0x88] sm:$0xff]   ;;  %v928_v19 = vrot.slane %v5276_v63, 1  ;;  %v2868_v63 = vshll.u32 %v5494_v37, 16 }
  0xa1   : > { %4459 = vmatprep.mubr.msk.bf16.mxu0 %vm452_vm2, %v2560_v5  ;;  %v5607_v5 = vld [vmem:[%s5141_s9 + $0x70] sm:$0xff]   ;;  %v2579_v23 = vrot.slane %v5634_v43, 2 }
  0xa2   : > { %v2573_v24 = vrot.slane %v5607_v5, 2  ;;  %v929_v51 = vsel %vm910_vm5, %v926_v35, %v928_v19 }
  0xa4   : > { %v2574_v6 = vsel %vm2110_vm4, %v2571_v33, %v2573_v24  ;;  %v927_v33 = vsel %vm910_vm5, %v924_v42, %v926_v35 }
  0xa5   : > { %4290 = vmatmul.mubr.msk.bf16.gmra.mrb[28].mxu1 %vm452_vm2, %v5345_v40 }
  0xa6   : > { %4293 = vmatprep.mubr.msk.bf16.mxu1 %vm452_vm2, %v5360_v56 }
  0xa8   : > { %4460 = vmatmul.mubr.msk.bf16.gmra.mrb[8].mxu0 %vm452_vm2, %v2562_v49  ;;  %v2575_v49 = vrot.slane %v5616_v21, 2 }
  0xa9   : > { %4463 = vmatprep.mubr.msk.bf16.mxu0 %vm452_vm2, %v2564_v36  ;;  %v5629_v36 = vld [vmem:[%s5141_s9 + $0x80] sm:$0xff]  }
  0xaa   : > { %v2577_v0 = vrot.slane %v5629_v36, 2 }
  0xad   : > { %4294 = vmatmul.mubr.msk.bf16.gmra.mrb[32].mxu1 %vm452_vm2, %v5367_v4 }
  0xae   : > { %4299 = vmatprep.mubr.msk.bf16.mxu1 %vm452_vm2, %v913_v18  ;;  %v2576_v18 = vsel %vm2110_vm4, %v2573_v24, %v2575_v49 }
  0xb0   : > { %4464 = vmatmul.mubr.msk.bf16.gmra.mrb[12].mxu0 %vm452_vm2, %v2566_v45  ;;  %v925_v45 = vsel %vm910_vm5, %v922_v30, %v924_v42  ;;  %v932_v30 = vrot.slane %v5303_v41, 1  ;;  %v2870_v42 = vrot.slane %v2868_v63, 3  ;;  %v2891_v41 = vshrl.u32 %v5514_v50, 16 }
  0xb1   : > { %4467 = vmatprep.mubr.msk.bf16.mxu0 %vm452_vm2, %v2568_v44  ;;  %v2578_v44 = vsel %vm2110_vm4, %v2575_v49, %v2577_v0  ;;  %v4965_v49 = vld [vmem:[%s5141_s9 + $0xa0] ss:$0 sps:$4 sm:$0x33]  }
  0xb5   : > { %4300 = vmatmul.mubr.msk.bf16.vlgmr.msra.gmra.mrb[0].mxu1 %vm452_vm2, %v915_v62  ;;  %v5647_v62 = vld [vmem:[%s5141_s9 + $0x90] sm:$0xff]  }
  0xb6   : > { %4303 = vmatprep.mubr.msk.bf16.mxu1 %vm452_vm2, %v917_v14  ;;  %4336 = vmatpush3.bf16.msra.mxu1 %v1442_v39  ;;  %v5651_v14 = vld [vmem:[%s5141_s9 + $0x98] sm:$0xff]   ;;  %v2580_v39 = vsel %vm2110_vm4, %v2577_v0, %v2579_v23  ;;  %v2581_v61 = vrot.slane %v5647_v62, 2  ;;  %v2585_v0 = vrot.slane %v4965_v49, 2 }
  0xb7   : > { %4858 = vmatprep.subr.msk.bf16.mxu1 %vm507_vm0, %v4969_v9  ;;  %v2873_v9 = vshrl.u32 %v5497_v38, 16 }
  0xb8   : > { %4468 = vmatmul.mubr.msk.bf16.gmra.mrb[16].mxu0 %vm452_vm2, %v2570_v34  ;;  %v2583_v34 = vrot.slane %v5651_v14, 2  ;;  %v2582_v24 = vsel %vm2110_vm4, %v2579_v23, %v2581_v61  ;;  %v2885_v23 = vshll.u32 %v5510_v46, 16 }
  0xb9   : > { %4471 = vmatprep.mubr.msk.bf16.mxu0 %vm452_vm2, %v2572_v17  ;;  %v2876_v17 = vshll.u32 %v5497_v38, 16  ;;  %v2875_v37 = vrot.slane %v2873_v9, 2  ;;  %v2893_v9 = vrot.slane %v2891_v41, 2  ;;  %v2918_v41 = vshrl.u32 %v5551_v3, 16 }
  0xbd   : > { %4304 = vmatmul.mubr.msk.bf16.gmra.mrb[4].mxu1 %vm452_vm2, %v919_v48  ;;  %v930_v48 = vrot.slane %v5293_v25, 1 }
  0xbe   : > { %4307 = vmatprep.mubr.msk.bf16.mxu1 %vm452_vm2, %v921_v54  ;;  %v2584_v54 = vsel %vm2110_vm4, %v2581_v61, %v2583_v34 }
  0xbf   : > { %v933_v25 = vsel %vm910_vm5, %v930_v48, %v932_v30 }
  0xc0   : > { %4472 = vmatmul.mubr.msk.bf16.gmra.mrb[20].mxu0 %vm452_vm2, %v2574_v6  ;;  %v2867_v6 = vrot.slane %v2865_v16, 2  ;;  %v936_v16 = vrot.slane %v5322_v11, 1  ;;  %v2909_v11 = vshrl.u32 %v5532_v28, 16 }
  0xc1   : > { %4475 = vmatprep.mubr.msk.bf16.mxu0 %vm452_vm2, %v2576_v18  ;;  %v2878_v18 = vrot.slane %v2876_v17, 3 }
  0xc2   : > { %v2871_v35 = vor.u32 %v2870_v42, %v2867_v6  ;;  %v2912_v6 = vshll.u32 %v5532_v28, 16 }
  0xc5   : > { %4308 = vmatmul.mubr.msk.bf16.gmra.mrb[8].mxu1 %vm452_vm2, %v923_v10  ;;  %v931_v10 = vsel %vm910_vm5, %v928_v19, %v930_v48  ;;  %v934_v19 = vrot.slane %v5317_v58, 1  ;;  %v2900_v58 = vshrl.u32 %v5526_v53, 16 }
  0xc6   : > { %4311 = vmatprep.mubr.msk.bf16.mxu1 %vm452_vm2, %v925_v45  ;;  %v2882_v45 = vshrl.u32 %v5510_v46, 16 }
  0xc7   : > { %v935_v48 = vsel %vm910_vm5, %v932_v30, %v934_v19  ;;  %v938_v30 = vrot.slane %v5339_v32, 1  ;;  %v2921_v32 = vshll.u32 %v5551_v3, 16 }
  0xc8   : > { %4476 = vmatmul.mubr.msk.bf16.gmra.mrb[24].mxu0 %vm452_vm2, %v2578_v44  ;;  %v2879_v44 = vor.u32 %v2878_v18, %v2875_v37  ;;  %v2884_v61 = vrot.slane %v2882_v45, 2  ;;  %v2902_v37 = vrot.slane %v2900_v58, 2  ;;  %v2911_v45 = vrot.slane %v2909_v11, 2 }
  0xc9   : > { %4479 = vmatprep.mubr.msk.bf16.mxu0 %vm452_vm2, %v2580_v39  ;;  %v2894_v39 = vshll.u32 %v5514_v50, 16  ;;  %v2936_v58 = vshrl.u32 %v5569_v13, 16  ;;  %v2948_v11 = vshll.u32 %v5574_v8, 16 }
  0xca   : > { %v2880_v63 = vsel %vm2863_vm6, %v2871_v35, %v2879_v44  ;;  %v939_v35 = vsel %vm910_vm5, %v936_v16, %v938_v30 }
  0xcb   : > { %v2896_v17 = vrot.slane %v2894_v39, 3 }
  0xcd   : > { %4312 = vmatmul.mubr.msk.bf16.gmra.mrb[12].mxu1 %vm452_vm2, %v927_v33  ;;  %v2586_v33 = vsel %vm2110_vm4, %v2583_v34, %v2585_v0  ;;  %v2903_v34 = vshll.u32 %v5526_v53, 16  ;;  %v2897_v49 = vor.u32 %v2896_v17, %v2893_v9  ;;  %v3403_v0 = vsel %vm507_vm0, %v5537_v29, 0 }
  0xce   : > { %4315 = vmatprep.mubr.msk.bf16.mxu1 %vm452_vm2, %v929_v51  ;;  %v2887_v51 = vrot.slane %v2885_v23, 3  ;;  %v2914_v23 = vrot.slane %v2912_v6, 3  ;;  %v2927_v29 = vshrl.u32 %v5555_v1, 16 }
  0xcf   : > { %v2905_v18 = vrot.slane %v2903_v34, 3  ;;  %v2939_v34 = vshll.u32 %v5569_v13, 16 }
  0xd0   : > { %4480 = vmatmul.mubr.msk.bf16.gmra.mrb[28].mxu0 %vm452_vm2, %v2582_v24  ;;  %v2888_v24 = vor.u32 %v2887_v51, %v2884_v61  ;;  %v2915_v39 = vor.u32 %v2914_v23, %v2911_v45  ;;  %v2920_v61 = vrot.slane %v2918_v41, 2  ;;  %v2923_v51 = vrot.slane %v2921_v32, 3 }
  0xd1   : > { %4483 = vmatprep.mubr.msk.bf16.mxu0 %vm452_vm2, %v2584_v54  ;;  %v937_v54 = vsel %vm910_vm5, %v934_v19, %v936_v16  ;;  %v2930_v19 = vshll.u32 %v5555_v1, 16  ;;  %v2929_v17 = vrot.slane %v2927_v29, 2  ;;  %v2950_v23 = vrot.slane %v2948_v11, 3  ;;  %v4971_v29 = vld [vmem:[%s5141_s9 + $0x18] sm:$0xff]  }
  0xd2   : > { %v2889_v42 = vsel %vm2863_vm6, %v2879_v44, %v2888_v24  ;;  %v2906_v44 = vor.u32 %v2905_v18, %v2902_v37  ;;  %v2941_v37 = vrot.slane %v2939_v34, 3  ;;  %v1350_v18 = vrot.slane %v5172_v20, 1 }
  0xd3   : > { %v2954_v32 = vshrl.u32 %v5587_v47, 16  ;;  %v2957_v20 = vshll.u32 %v5587_v47, 16  ;;  %v2975_v34 = vshll.u32 %v5607_v5, 16  ;;  %v2984_v11 = vshll.u32 %v5616_v21, 16 }
  0xd4   : > { %v2907_v16 = vsel %vm2863_vm6, %v2897_v49, %v2906_v44  ;;  %v2916_v9 = vsel %vm2863_vm6, %v2906_v44, %v2915_v39 }
  0xd5   : > { %4316 = vmatmul.mubr.msk.bf16.gmra.mrb[16].mxu1 %vm452_vm2, %v931_v10  ;;  %v940_v10 = vrot.slane %v5345_v40, 1 }
  0xd6   : > { %4319 = vmatprep.mubr.msk.bf16.mxu1 %vm452_vm2, %v933_v25  ;;  %v2898_v25 = vsel %vm2863_vm6, %v2888_v24, %v2897_v49 }
  0xd7   : > { %v941_v40 = vsel %vm910_vm5, %v938_v30, %v940_v10  ;;  %v946_v30 = vrot.slane %v5390_v27, 1 }
  0xd8   : > { %4484 = vmatmul.mubr.msk.bf16.gmra.mrb[32].mxu0 %vm452_vm2, %v2586_v33  ;;  %v942_v33 = vrot.slane %v5360_v56, 1 }
  0xd9   : > { %4489 = vmatprep.mubr.msk.bf16.mxu0 %vm452_vm2, %v2880_v63  ;;  %v944_v63 = vrot.slane %v5367_v4, 1  ;;  %v2945_v4 = vshrl.u32 %v5574_v8, 16 }
  0xda   : > { %v943_v24 = vsel %vm910_vm5, %v940_v10, %v942_v33  ;;  %v4970_v10 = vld [vmem:[%s5141_s9 + $0x10] sm:$0xff]  }
  0xdb   : > { %v945_v56 = vsel %vm910_vm5, %v942_v33, %v944_v63  ;;  %v2947_v45 = vrot.slane %v2945_v4, 2  ;;  %v2981_v4 = vshrl.u32 %v5616_v21, 16 }
  0xdd   : > { %4320 = vmatmul.mubr.msk.bf16.gmra.mrb[20].mxu1 %vm452_vm2, %v935_v48  ;;  %v2932_v48 = vrot.slane %v2930_v19, 3  ;;  %v2951_v44 = vor.u32 %v2950_v23, %v2947_v45  ;;  %v1353_v19 = vrot.slane %v4971_v29, 1  ;;  %v2983_v45 = vrot.slane %v2981_v4, 2 }
  0xde   : > { %4323 = vmatprep.mubr.msk.bf16.mxu1 %vm452_vm2, %v937_v54  ;;  %v2924_v54 = vor.u32 %v2923_v51, %v2920_v61  ;;  %v2956_v61 = vrot.slane %v2954_v32, 2  ;;  %v2959_v51 = vrot.slane %v2957_v20, 3  ;;  %v2986_v23 = vrot.slane %v2984_v11, 3  ;;  %v4977_v11 = vld [vmem:[%s5141_s9 + $0x48] sm:$0xff]  }
  0xdf   : > { %v2933_v49 = vor.u32 %v2932_v48, %v2929_v17  ;;  %v2993_v32 = vshll.u32 %v5629_v36, 16  ;;  %v3020_v4 = vshll.u32 %v5651_v14, 16 }
  0xe0   : > { %4490 = vmatmul.mubr.msk.bf16.vlgmr.msra.gmra.mrb[0].mxu0 %vm452_vm2, %v2889_v42  ;;  %v2925_v6 = vsel %vm2863_vm6, %v2915_v39, %v2924_v54  ;;  %v2938_v42 = vrot.slane %v2936_v58, 2  ;;  %v2966_v39 = vshll.u32 %v5592_v52, 16  ;;  %v2972_v58 = vshrl.u32 %v5607_v5, 16 }
  0xe1   : > { %4526 = vmatpush3.bf16.msra.mxu0 %v3403_v0  ;;  %4493 = vmatprep.mubr.msk.bf16.mxu0 %vm452_vm2, %v2898_v25  ;;  %v1351_v0 = vrot.slane %v4970_v10, 1  ;;  %v2934_v25 = vsel %vm2863_vm6, %v2924_v54, %v2933_v49  ;;  %v2960_v54 = vor.u32 %v2959_v51, %v2956_v61  ;;  %v4974_v10 = vld [vmem:[%s5141_s9 + $0x30] sm:$0xff]   ;;  %v2987_v20 = vor.u32 %v2986_v23, %v2983_v45  ;;  %v4976_v51 = vld [vmem:[%s5141_s9 + $0x40] sm:$0xff]  }
  0xe2   : > { %v2942_v41 = vor.u32 %v2941_v37, %v2938_v42  ;;  %v2968_v48 = vrot.slane %v2966_v39, 3  ;;  %v2974_v37 = vrot.slane %v2972_v58, 2  ;;  %v4975_v39 = vld [vmem:[%s5141_s9 + $0x38] sm:$0xff]   ;;  %v2995_v61 = vrot.slane %v2993_v32, 3 }
  0xe3   : > { %v1352_v27 = vsel %vm910_vm5, %v1350_v18, %v1351_v0  ;;  %v2961_v42 = vsel %vm2863_vm6, %v2951_v44, %v2960_v54  ;;  %v2977_v18 = vrot.slane %v2975_v34, 3  ;;  %v1361_v29 = vrot.slane %v4975_v39, 1 }
  0xe4   : > { %v2943_v33 = vsel %vm2863_vm6, %v2933_v49, %v2942_v41  ;;  %v3011_v58 = vshll.u32 %v5647_v62, 16  ;;  %v3022_v23 = vrot.slane %v3020_v4, 3  ;;  %v3316_v4 = vrot.slane %v5514_v50, 3 }
  0xe5   : > { %4324 = vmatmul.mubr.msk.bf16.gmra.mrb[24].mxu1 %vm452_vm2, %v939_v35  ;;  %v947_v35 = vsel %vm910_vm5, %v944_v63, %v946_v30  ;;  %v3318_v50 = vrot.slane %v5526_v53, 3 }
  0xe6   : > { %4327 = vmatprep.mubr.msk.bf16.mxu1 %vm452_vm2, %v941_v40  ;;  %v2963_v40 = vshrl.u32 %v5592_v52, 16 }
  0xe8   : > { %4494 = vmatmul.mubr.msk.bf16.gmra.mrb[4].mxu0 %vm452_vm2, %v2907_v16  ;;  %v4972_v16 = vld [vmem:[%s5141_s9 + $0x20] sm:$0xff]   ;;  %v2965_v17 = vrot.slane %v2963_v40, 2  ;;  %v3002_v40 = vshll.u32 %v5634_v43, 16 }
  0xe9   : > { %4497 = vmatprep.mubr.msk.bf16.mxu0 %vm452_vm2, %v2916_v9  ;;  %v1355_v63 = vrot.slane %v4972_v16, 1  ;;  %v2952_v9 = vsel %vm2863_vm6, %v2942_v41, %v2951_v44  ;;  %v2978_v41 = vor.u32 %v2977_v18, %v2974_v37  ;;  %v2999_v44 = vshrl.u32 %v5634_v43, 16  ;;  %v4978_v18 = vld [vmem:[%s5141_s9 + $0x50] sm:$0xff]  }
  0xea   : > { %v2969_v49 = vor.u32 %v2968_v48, %v2965_v17  ;;  %v1363_v16 = vrot.slane %v4976_v51, 1  ;;  %v3004_v17 = vrot.slane %v3002_v40, 3  ;;  %v3013_v37 = vrot.slane %v3011_v58, 3  ;;  %v4979_v40 = vld [vmem:[%s5141_s9 + $0x58] sm:$0xff]  }
  0xeb   : > { %v1369_v39 = vrot.slane %v4979_v40, 1  ;;  %v1772_v40 = vshrl.u32 %v5436_v57, 16 }
  0xed   : > { %4328 = vmatmul.mubr.msk.bf16.gmra.mrb[28].mxu1 %vm452_vm2, %v943_v24  ;;  %v1354_v24 = vsel %vm910_vm5, %v1351_v0, %v1353_v19  ;;  %v1359_v0 = vrot.slane %v4974_v10, 1  ;;  %v1367_v10 = vrot.slane %v4978_v18, 1  ;;  %v3320_v18 = vrot.slane %v5532_v28, 3 }
  0xee   : > { %4331 = vmatprep.mubr.msk.bf16.mxu1 %vm452_vm2, %v945_v56  ;;  %v1356_v56 = vsel %vm910_vm5, %v1353_v19, %v1355_v63  ;;  %v2979_v19 = vsel %vm2863_vm6, %v2969_v49, %v2978_v41 }
  0xef   : > { %v1362_v48 = vsel %vm910_vm5, %v1359_v0, %v1361_v29  ;;  %v3321_v53 = vsel %vm3310_vm7, %v3318_v50, %v3320_v18 }
  0xf0   : > { %4498 = vmatmul.mubr.msk.bf16.gmra.mrb[8].mxu0 %vm452_vm2, %v2925_v6  ;;  %v4973_v6 = vld [vmem:[%s5141_s9 + $0x28] sm:$0xff]  }
  0xf1   : > { %4501 = vmatprep.mubr.msk.bf16.mxu0 %vm452_vm2, %v2934_v25  ;;  %v1357_v30 = vrot.slane %v4973_v6, 1  ;;  %v2970_v25 = vsel %vm2863_vm6, %v2960_v54, %v2969_v49  ;;  %v1364_v54 = vsel %vm910_vm5, %v1361_v29, %v1363_v16  ;;  %v3017_v49 = vshrl.u32 %v5651_v14, 16 }
  0xf2   : > { %v1365_v6 = vrot.slane %v4977_v11, 1  ;;  %v1377_v11 = vrot.slane %v5454_v7, 1 }
  0xf3   : > { %v3019_v45 = vrot.slane %v3017_v49, 2 }
  0xf5   : > { %4332 = vmatmul.mubr.msk.bf16.gmra.mrb[32].mxu1 %vm452_vm2, %v947_v35  ;;  %v1358_v35 = vsel %vm910_vm5, %v1355_v63, %v1357_v30  ;;  %v2988_v63 = vsel %vm2863_vm6, %v2978_v41, %v2987_v20 }
  0xf6   : > { %4337 = vmatprep.mubr.msk.bf16.mxu1 %vm452_vm2, %v1352_v27  ;;  %v2990_v27 = vshrl.u32 %v5629_v36, 16 }
  0xf8   : > { %4502 = vmatmul.mubr.msk.bf16.gmra.mrb[12].mxu0 %vm452_vm2, %v2943_v33  ;;  %v2992_v33 = vrot.slane %v2990_v27, 2 }
  0xf9   : > { %4505 = vmatprep.mubr.msk.bf16.mxu0 %vm452_vm2, %v2952_v9  ;;  %v3001_v9 = vrot.slane %v2999_v44, 2  ;;  %v3304_v44 = vld [vmem:[%s5141_s9 + $0x10] sm:$0x8] }
  0xfb   : > { %v3005_v34 = vor.u32 %v3004_v17, %v3001_v9 }
  0xfd   : > { %4338 = vmatmul.mubr.msk.bf16.vlgmr.msra.gmra.mrb[0].mxu1 %vm452_vm2, %v1354_v24  ;;  %v2996_v24 = vor.u32 %v2995_v61, %v2992_v33  ;;  %v1371_v61 = vrot.slane %v5417_v55, 1 }
  0xfe   : > { %4341 = vmatprep.mubr.msk.bf16.mxu1 %vm452_vm2, %v1356_v56  ;;  %4564 = vmatpush3.bf16.msra.mxu1 %v5125_v2  ;;  %v1360_v2 = vsel %vm910_vm5, %v1357_v30, %v1359_v0  ;;  %v3008_v56 = vshrl.u32 %v5647_v62, 16  ;;  %v5787_v0 = vld [vmem:[%s5141_s9 + $0xa0] ss:$0 sps:$4 sm:$0x77]  }
  0xff   : > { %v2997_v30 = vsel %vm2863_vm6, %v2987_v20, %v2996_v24  ;;  %v3026_v27 = vshrl.u32 %v5787_v0, 16  ;;  %v3029_v32 = vshll.u32 %v5787_v0, 16  ;;  %v3023_v20 = vor.u32 %v3022_v23, %v3019_v45 }
 0x100   : > { %4506 = vmatmul.mubr.msk.bf16.gmra.mrb[16].mxu0 %vm452_vm2, %v2961_v42  ;;  %v3010_v42 = vrot.slane %v3008_v56, 2  ;;  %v1372_v17 = vsel %vm910_vm5, %v1369_v39, %v1371_v61  ;;  %v1375_v56 = vrot.slane %v5442_v60, 1  ;;  %v1383_v45 = vrot.slane %v5474_v26, 1 }
 0x101   : > { %4509 = vmatprep.mubr.msk.bf16.mxu0 %vm452_vm2, %v2970_v25  ;;  %v3006_v25 = vsel %vm2863_vm6, %v2996_v24, %v3005_v34  ;;  %v3031_v33 = vrot.slane %v3029_v32, 3  ;;  %v3312_v24 = vrot.slane %v5497_v38, 3  ;;  %v3314_v38 = vrot.slane %v5510_v46, 3 }
 0x102   : > { %v3014_v41 = vor.u32 %v3013_v37, %v3010_v42  ;;  %v1378_v46 = vsel %vm910_vm5, %v1375_v56, %v1377_v11  ;;  %v1763_v23 = vshrl.u32 %v5417_v55, 16 }
 0x103   : > { %v3317_v42 = vsel %vm3310_vm7, %v3314_v38, %v3316_v4 }
 0x104   : > { %v3015_v29 = vsel %vm2863_vm6, %v3005_v34, %v3014_v41  ;;  %v3024_v51 = vsel %vm2863_vm6, %v3014_v41, %v3023_v20  ;;  %v4968_v41 = vld [vmem:[%s5141_s9 + $0x98] ss:$0 sps:$4 sm:$0x11]   ;;  %v1765_v32 = vrot.slane %v1763_v23, 1  ;;  %s4865_s9 = smul.u32 4608, %s5088_s16  ;;  %s6037_s16 = scalar_lea.sflag [#allocation3], %s161_s4 }
 0x105   : > { %4342 = vmatmul.mubr.msk.bf16.gmra.mrb[4].mxu1 %vm452_vm2, %v1358_v35  ;;  %v1366_v35 = vsel %vm910_vm5, %v1363_v16, %v1365_v6  ;;  %v4027_v16 = vcombine.low %v3304_v44, %v5484_v31  ;;  %v3324_v44 = vrot.slane %v5555_v1, 3 }
 0x106   : > { %4345 = vmatprep.mubr.msk.bf16.mxu1 %vm452_vm2, %v1360_v2  ;;  %v1368_v2 = vsel %vm910_vm5, %v1365_v6, %v1367_v10  ;;  %v3315_v6 = vsel %vm3310_vm7, %v3312_v24, %v3314_v38  ;;  %s6028_s19 = scalar_lea.hbm %s6081_s3, %s4865_s9 }
 0x108   : > { %4510 = vmatmul.mubr.msk.bf16.gmra.mrb[20].mxu0 %vm452_vm2, %v2979_v19  ;;  %v3028_v19 = vrot.slane %v3026_v27, 2 }
 0x109   : > { %4513 = vmatprep.mubr.msk.bf16.mxu0 %vm452_vm2, %v2988_v63  ;;  %v1370_v63 = vsel %vm910_vm5, %v1367_v10, %v1369_v39  ;;  %v1381_v10 = vrot.slane %v5470_v22, 1  ;;  %v1775_v39 = vshll.u32 %v5436_v57, 16 }
 0x10a   : > { %v3032_v9 = vor.u32 %v3031_v33, %v3028_v19  ;;  %v1784_v33 = vshll.u32 %v5442_v60, 16 }
 0x10b   : > { %v1384_v27 = vsel %vm910_vm5, %v1381_v10, %v1383_v45 }
 0x10c   : > { %v3033_v31 = vsel %vm2863_vm6, %v3023_v20, %v3032_v9 }
 0x10d   : > { %4346 = vmatmul.mubr.msk.bf16.gmra.mrb[8].mxu1 %vm452_vm2, %v1362_v48  ;;  %v3311_v48 = vrot.slane %v4027_v16, 3  ;;  %v1777_v16 = vrot.slane %v1775_v39, 2 }
 0x10e   : > { %4349 = vmatprep.mubr.msk.bf16.mxu1 %vm452_vm2, %v1364_v54  ;;  %v1373_v54 = vrot.slane %v5436_v57, 1 }
 0x10f   : > { %v3313_v58 = vsel %vm3310_vm7, %v3311_v48, %v3312_v24  ;;  %v3328_v48 = vrot.slane %v5574_v8, 3  ;;  %v1790_v24 = vshrl.u32 %v5454_v7, 16 }
 0x110   : > { %4514 = vmatmul.mubr.msk.bf16.gmra.mrb[24].mxu0 %vm452_vm2, %v2997_v30  ;;  %v1374_v34 = vsel %vm910_vm5, %v1371_v61, %v1373_v54  ;;  %v1376_v49 = vsel %vm910_vm5, %v1373_v54, %v1375_v56  ;;  %v1379_v30 = vrot.slane %v5458_v12, 1  ;;  %v1793_v54 = vshll.u32 %v5454_v7, 16 }
 0x111   : > { %4517 = vmatprep.mubr.msk.bf16.mxu0 %vm452_vm2, %v3006_v25  ;;  %v3319_v25 = vsel %vm3310_vm7, %v3316_v4, %v3318_v50 }
 0x112   : > { %v1380_v37 = vsel %vm910_vm5, %v1377_v11, %v1379_v30  ;;  %v1382_v28 = vsel %vm910_vm5, %v1379_v30, %v1381_v10  ;;  %v1795_v38 = vrot.slane %v1793_v54, 2  ;;  %v1808_v30 = vshrl.u32 %v5470_v22, 16 }
 0x114   : > { %v1810_v10 = vrot.slane %v1808_v30, 1 }
 0x115   : > { %4350 = vmatmul.mubr.msk.bf16.gmra.mrb[12].mxu1 %vm452_vm2, %v1366_v35  ;;  %v1766_v35 = vshll.u32 %v5417_v55, 16  ;;  %v1385_v55 = vrot.slane %v4968_v41, 1  ;;  %v1829_v41 = vshll.u32 %v5490_v59, 16 }
 0x116   : > { %4353 = vmatprep.mubr.msk.bf16.mxu1 %vm452_vm2, %v1368_v2  ;;  %v3322_v2 = vrot.slane %v5551_v3, 3  ;;  %v1781_v3 = vshrl.u32 %v5442_v60, 16 }
 0x117   : > { %v1768_v20 = vrot.slane %v1766_v35, 2  ;;  %v1386_v1 = vsel %vm910_vm5, %v1383_v45, %v1385_v55  ;;  %v3334_v45 = vrot.slane %v5607_v5, 3 }
 0x118   : > { %4518 = vmatmul.mubr.msk.bf16.gmra.mrb[28].mxu0 %vm452_vm2, %v3015_v29  ;;  %v3323_v29 = vsel %vm3310_vm7, %v3320_v18, %v3322_v2  ;;  %v3325_v61 = vsel %vm3310_vm7, %v3322_v2, %v3324_v44  ;;  %v1783_v9 = vrot.slane %v1781_v3, 1  ;;  %v3344_v3 = vrot.slane %v5651_v14, 3 }
 0x119   : > { %4521 = vmatprep.mubr.msk.bf16.mxu0 %vm452_vm2, %v3024_v51  ;;  %v1769_v19 = vor.u32 %v1768_v20, %v1765_v32  ;;  %v1774_v51 = vrot.slane %v1772_v40, 1  ;;  %v3340_v40 = vrot.slane %v5634_v43, 3 }
 0x11b   : > { %v1770_v57 = vsel %vm1663_vm3, %v5331_v15, %v1769_v19  ;;  %v1778_v60 = vor.u32 %v1777_v16, %v1774_v51  ;;  %v1802_v15 = vshll.u32 %v5458_v12, 16 }
 0x11d   : > { %4354 = vmatmul.mubr.msk.bf16.gmra.mrb[16].mxu1 %vm452_vm2, %v1370_v63  ;;  %v3326_v63 = vrot.slane %v5569_v13, 3  ;;  %v1799_v13 = vshrl.u32 %v5458_v12, 16  ;;  %v1779_v8 = vsel %vm1663_vm3, %v1769_v19, %v1778_v60  ;;  %v1804_v11 = vrot.slane %v1802_v15, 2 }
 0x11e   : > { %4357 = vmatprep.mubr.msk.bf16.mxu1 %vm452_vm2, %v1372_v17  ;;  %v1786_v17 = vrot.slane %v1784_v33, 2 }
 0x11f   : > { %v1801_v4 = vrot.slane %v1799_v13, 1 }
 0x120   : > { %4522 = vmatmul.mubr.msk.bf16.gmra.mrb[32].mxu0 %vm452_vm2, %v3033_v31  ;;  %v3327_v31 = vsel %vm3310_vm7, %v3324_v44, %v3326_v63  ;;  %v1787_v56 = vor.u32 %v1786_v17, %v1783_v9  ;;  %v3338_v44 = vrot.slane %v5629_v36, 3  ;;  %v3342_v36 = vrot.slane %v5647_v62, 3 }
 0x121   : > { %4527 = vmatprep.mubr.msk.bf16.mxu0 %vm452_vm2, %v3313_v58  ;;  %v3329_v58 = vsel %vm3310_vm7, %v3326_v63, %v3328_v48  ;;  %v1805_v50 = vor.u32 %v1804_v11, %v1801_v4 }
 0x122   : > { %v1788_v7 = vsel %vm1663_vm3, %v1778_v60, %v1787_v56  ;;  %v3343_v43 = vsel %vm3310_vm7, %v3340_v40, %v3342_v36  ;;  %v3345_v33 = vsel %vm3310_vm7, %v3342_v36, %v3344_v3 }
 0x125   : > { %4358 = vmatmul.mubr.msk.bf16.gmra.mrb[20].mxu1 %vm452_vm2, %v1374_v34  ;;  %v1792_v34 = vrot.slane %v1790_v24, 1 }
 0x126   : > { %4361 = vmatprep.mubr.msk.bf16.mxu1 %vm452_vm2, %v1376_v49  ;;  %v3330_v49 = vrot.slane %v5587_v47, 3  ;;  %v1817_v47 = vshrl.u32 %v5474_v26, 16 }
 0x127   : > { %v1796_v12 = vor.u32 %v1795_v38, %v1792_v34 }
 0x128   : > { %4528 = vmatmul.mubr.msk.bf16.vlgmr.msra.gmra.mrb[0].mxu0 %vm452_vm2, %v3315_v6  ;;  %v3332_v6 = vrot.slane %v5592_v52, 3  ;;  %v1819_v23 = vrot.slane %v1817_v47, 1 }
 0x129   : > { %4531 = vmatprep.mubr.msk.bf16.mxu0 %vm452_vm2, %v3317_v42  ;;  %v1811_v42 = vshll.u32 %v5470_v22, 16  ;;  %v1797_v52 = vsel %vm1663_vm3, %v1787_v56, %v1796_v12  ;;  %v1806_v22 = vsel %vm1663_vm3, %v1796_v12, %v1805_v50 }
 0x12a   : > { %v3333_v18 = vsel %vm3310_vm7, %v3330_v49, %v3332_v6  ;;  %v3335_v2 = vsel %vm3310_vm7, %v3332_v6, %v3334_v45 }
 0x12d   : > { %4362 = vmatmul.mubr.msk.bf16.gmra.mrb[24].mxu1 %vm452_vm2, %v1378_v46  ;;  %v3331_v46 = vsel %vm3310_vm7, %v3328_v48, %v3330_v49  ;;  %v5942_v49 = vld [vmem:[%s6080_s2] ss:$0 sm:$0xff] }
 0x12e   : > { %4365 = vmatprep.mubr.msk.bf16.mxu1 %vm452_vm2, %v1380_v37  ;;  %v1820_v37 = vshll.u32 %v5474_v26, 16 }
 0x130   : > { %4532 = vmatmul.mubr.msk.bf16.gmra.mrb[4].mxu0 %vm452_vm2, %v3319_v25  ;;  %v1813_v25 = vrot.slane %v1811_v42, 2  ;;  %v1822_v35 = vrot.slane %v1820_v37, 2 }
 0x131   : > { %4535 = vmatprep.mubr.msk.bf16.mxu0 %vm452_vm2, %v3321_v53  ;;  %v3336_v53 = vrot.slane %v5616_v21, 3  ;;  %v1831_v21 = vrot.slane %v1829_v41, 2 }
 0x132   : > { %v1814_v26 = vor.u32 %v1813_v25, %v1810_v10 }
 0x133   : > { %v3337_v5 = vsel %vm3310_vm7, %v3334_v45, %v3336_v53  ;;  %v3339_v39 = vsel %vm3310_vm7, %v3336_v53, %v3338_v44 }
 0x134   : > { %v1815_v32 = vsel %vm1663_vm3, %v1805_v50, %v1814_v26 }
 0x135   : > { %4366 = vmatmul.mubr.msk.bf16.gmra.mrb[28].mxu1 %vm452_vm2, %v1382_v28  ;;  %v1826_v28 = vshrl.u32 %v5490_v59, 16 }
 0x136   : > { %4369 = vmatprep.mubr.msk.bf16.mxu1 %vm452_vm2, %v1384_v27  ;;  %v1823_v27 = vor.u32 %v1822_v35, %v1819_v23 }
 0x137   : > { %v1828_v20 = vrot.slane %v1826_v28, 1 }
 0x138   : > { %4536 = vmatmul.mubr.msk.bf16.gmra.mrb[8].mxu0 %vm452_vm2, %v3323_v29  ;;  %v1824_v55 = vsel %vm1663_vm3, %v1814_v26, %v1823_v27  ;;  %v3341_v29 = vsel %vm3310_vm7, %v3338_v44, %v3340_v40 }
 0x139   : > { %4539 = vmatprep.mubr.msk.bf16.mxu0 %vm452_vm2, %v3325_v61  ;;  %v1832_v59 = vor.u32 %v1831_v21, %v1828_v20  ;;  %v3346_v61 = vrot.slane %v5787_v0, 3 }
 0x13b   : > { %v1833_v19 = vsel %vm1663_vm3, %v1823_v27, %v1832_v59 }
 0x13d   : > { %4370 = vmatmul.mubr.msk.bf16.gmra.mrb[32].mxu1 %vm452_vm2, %v1386_v1  ;;  %v3347_v1 = vsel %vm3310_vm7, %v3344_v3, %v3346_v61 }
 0x13e   : > { %4395 = vmatprep.mubr.msk.bf16.mxu1 %vm452_vm2, %v1770_v57 }
 0x140   : > { %4540 = vmatmul.mubr.msk.bf16.gmra.mrb[12].mxu0 %vm452_vm2, %v3327_v31 }
 0x141   : > { %4543 = vmatprep.mubr.msk.bf16.mxu0 %vm452_vm2, %v3329_v58 }
 0x145   : > { %4396 = vmatmul.mubr.msk.bf16.vlgmr.msra.gmra.mrb[20].mxu1 %vm452_vm2, %v1779_v8 }
 0x146   : > { %4399 = vmatprep.mubr.msk.bf16.mxu1 %vm452_vm2, %v1788_v7 }
 0x148   : > { %4544 = vmatmul.mubr.msk.bf16.gmra.mrb[16].mxu0 %vm452_vm2, %v3331_v46 }
 0x149   : > { %4547 = vmatprep.mubr.msk.bf16.mxu0 %vm452_vm2, %v3333_v18 }
 0x14d   : > { %4400 = vmatmul.mubr.msk.bf16.gmra.mrb[24].mxu1 %vm452_vm2, %v1797_v52 }
 0x14e   : > { %4403 = vmatprep.mubr.msk.bf16.mxu1 %vm452_vm2, %v1806_v22 }
 0x150   : > { %4548 = vmatmul.mubr.msk.bf16.gmra.mrb[20].mxu0 %vm452_vm2, %v3335_v2 }
 0x151   : > { %4551 = vmatprep.mubr.msk.bf16.mxu0 %vm452_vm2, %v3337_v5 }
 0x155   : > { %4404 = vmatmul.mubr.msk.bf16.gmra.mrb[28].mxu1 %vm452_vm2, %v1815_v32 }
 0x156   : > { %4407 = vmatprep.mubr.msk.bf16.mxu1 %vm452_vm2, %v1824_v55 }
 0x158   : > { %4552 = vmatmul.mubr.msk.bf16.gmra.mrb[24].mxu0 %vm452_vm2, %v3339_v39 }
 0x159   : > { %4555 = vmatprep.mubr.msk.bf16.mxu0 %vm452_vm2, %v3341_v29 }
 0x15d   : > { %4408 = vmatmul.mubr.msk.bf16.gmra.mrb[32].mxu1 %vm452_vm2, %v1833_v19 }
 0x160   : > { %4556 = vmatmul.mubr.msk.bf16.gmra.mrb[28].mxu0 %vm452_vm2, %v3343_v43 }
 0x161   : > { %4559 = vmatprep.mubr.msk.bf16.mxu0 %vm452_vm2, %v3345_v33 }
 0x168   : > { %4560 = vmatmul.mubr.msk.bf16.gmra.mrb[32].mxu0 %vm452_vm2, %v3347_v1 }
 0x1d0   : > { %v4339_v51 = vpop.f32.mrb[0].mxu1 }
 0x1d1   : > { %v1478_v62 = vpop.f32.mrb[1].mxu1 }
 0x1d2   : > { %v4340_v16 = vpop.f32.mrb[2].mxu1 }
 0x1d3   : > { %v1481_v14 = vpop.f32.mrb[3].mxu1 }
 0x1d8   : > { %v4343_v63 = vpop.f32.mrb[4].mxu1 }
 0x1d9   : > { %v1494_v57 = vpop.f32.mrb[5].mxu1 }
 0x1da   : > { %v4344_v9 = vpop.f32.mrb[6].mxu1 }
 0x1db   : > { %v1497_v17 = vpop.f32.mrb[7].mxu1 }
 0x1e0   : > { %v4347_v48 = vpop.f32.mrb[8].mxu1 }
 0x1e1   : > { %v1510_v60 = vpop.f32.mrb[9].mxu1 }
 0x1e2   : > { %v4348_v24 = vpop.f32.mrb[10].mxu1 }
 0x1e3   : > { %v1513_v54 = vpop.f32.mrb[11].mxu1 }
 0x1e8   : > { %v5920_v31 = vpop.f32.mrb[12].mxu1 }
 0x1e9   : > { %v5922_v0 = vpop.f32.mrb[13].mxu1 }
 0x1ea   : > { %v5924_v56 = vpop.f32.mrb[14].mxu1 }
 0x1eb   : > { %v5926_v13 = vpop.f32.mrb[15].mxu1 }
 0x1f0   : > { %v5928_v15 = vpop.f32.mrb[16].mxu1 }
 0x1f1   : > { %v5930_v58 = vpop.f32.mrb[17].mxu1 }
 0x1f2   : > { %v5932_v8 = vpop.f32.mrb[18].mxu1 }
 0x1f3   : > { %v5934_v34 = vpop.f32.mrb[19].mxu1 }
 0x1fb   : > { %v4529_v38 = vpop.f32.mrb[0].mxu0 }
 0x1fc   : > { %v4565_v7 = vadd.f32 %v4529_v38, %v4339_v51  ;;  %v3439_v4 = vpop.f32.mrb[1].mxu0 }
 0x1fd   : > { %v4566_v11 = vadd.f32 %v3439_v4, %v1478_v62  ;;  %v4530_v6 = vpop.f32.mrb[2].mxu0 }
 0x1fe   : > { %v3627_v12 = vadd.f32 %v4565_v7, %v5942_v49  ;;  %v4567_v30 = vadd.f32 %v4530_v6, %v4340_v16  ;;  %v3442_v42 = vpop.f32.mrb[3].mxu0 }
 0x1ff   : > { %v3625_v46 = vadd.f32 %v4566_v11, %v5942_v49  ;;  %v4568_v50 = vadd.f32 %v3442_v42, %v1481_v14 }
 0x200   : > { %v3663_v47 = vmax.f32 %v3627_v12, 0.0  ;;  %v3628_v37 = vadd.f32 %v4567_v30, %v5942_v49 }
 0x201   : > { %v3661_v18 = vmax.f32 %v3625_v46, 0.0  ;;  %v3626_v52 = vadd.f32 %v4568_v50, %v5942_v49 }
 0x202   : > { %3699 = vst [vmem:[%s5948_s8 + $0x10] sm:$0xff] %v3663_v47  ;;  %v3664_v10 = vmax.f32 %v3628_v37, 0.0 }
 0x203   : > { %3697 = vst [vmem:[%s5948_s8] sm:$0xff] %v3661_v18  ;;  %v3662_v25 = vmax.f32 %v3626_v52, 0.0  ;;  %v4533_v45 = vpop.f32.mrb[4].mxu0 }
 0x204   : > { %3700 = vst [vmem:[%s5948_s8 + $0x18] sm:$0xff] %v3664_v10  ;;  %v4569_v22 = vadd.f32 %v4533_v45, %v4343_v63  ;;  %v3455_v23 = vpop.f32.mrb[5].mxu0 }
 0x205   : > { %3698 = vst [vmem:[%s5948_s8 + $0x8] sm:$0xff] %v3662_v25  ;;  %v4570_v35 = vadd.f32 %v3455_v23, %v1494_v57  ;;  %v4534_v53 = vpop.f32.mrb[6].mxu0 }
 0x206   : > { %v3631_v26 = vadd.f32 %v4569_v22, %v5942_v49  ;;  %v4571_v28 = vadd.f32 %v4534_v53, %v4344_v9  ;;  %v3458_v41 = vpop.f32.mrb[7].mxu0 }
 0x207   : > { %v3629_v2 = vadd.f32 %v4570_v35, %v5942_v49  ;;  %v4572_v27 = vadd.f32 %v3458_v41, %v1497_v17 }
 0x208   : > { %v3667_v5 = vmax.f32 %v3631_v26, 0.0  ;;  %v3632_v32 = vadd.f32 %v4571_v28, %v5942_v49 }
 0x209   : > { %v3665_v20 = vmax.f32 %v3629_v2, 0.0  ;;  %v3630_v21 = vadd.f32 %v4572_v27, %v5942_v49 }
 0x20a   : > { %3703 = vst [vmem:[%s5948_s8 + $0x30] sm:$0xff] %v3667_v5  ;;  %v3668_v44 = vmax.f32 %v3632_v32, 0.0 }
 0x20b   : > { %3701 = vst [vmem:[%s5948_s8 + $0x20] sm:$0xff] %v3665_v20  ;;  %v3666_v55 = vmax.f32 %v3630_v21, 0.0  ;;  %v4537_v40 = vpop.f32.mrb[8].mxu0 }
 0x20c   : > { %3704 = vst [vmem:[%s5948_s8 + $0x38] sm:$0xff] %v3668_v44  ;;  %v4573_v59 = vadd.f32 %v4537_v40, %v4347_v48  ;;  %v3471_v39 = vpop.f32.mrb[9].mxu0 }
 0x20d   : > { %3702 = vst [vmem:[%s5948_s8 + $0x28] sm:$0xff] %v3666_v55  ;;  %v4574_v29 = vadd.f32 %v3471_v39, %v1510_v60  ;;  %v4538_v19 = vpop.f32.mrb[10].mxu0 }
 0x20e   : > { %v3635_v36 = vadd.f32 %v4573_v59, %v5942_v49  ;;  %v4575_v3 = vadd.f32 %v4538_v19, %v4348_v24  ;;  %v3474_v43 = vpop.f32.mrb[11].mxu0 }
 0x20f   : > { %v3633_v33 = vadd.f32 %v4574_v29, %v5942_v49  ;;  %v4576_v61 = vadd.f32 %v3474_v43, %v1513_v54 }
 0x210   : > { %v3671_v1 = vmax.f32 %v3635_v36, 0.0  ;;  %v3636_v51 = vadd.f32 %v4575_v3, %v5942_v49 }
 0x211   : > { %v3669_v62 = vmax.f32 %v3633_v33, 0.0  ;;  %v3634_v16 = vadd.f32 %v4576_v61, %v5942_v49 }
 0x212   : > { %3707 = vst [vmem:[%s5948_s8 + $0x50] sm:$0xff] %v3671_v1  ;;  %v3672_v14 = vmax.f32 %v3636_v51, 0.0 }
 0x213   : > { %3705 = vst [vmem:[%s5948_s8 + $0x40] sm:$0xff] %v3669_v62  ;;  %v3670_v63 = vmax.f32 %v3634_v16, 0.0  ;;  %v4541_v57 = vpop.f32.mrb[12].mxu0 }
 0x214   : > { %3708 = vst [vmem:[%s5948_s8 + $0x58] sm:$0xff] %v3672_v14  ;;  %v4577_v9 = vadd.f32 %v4541_v57, %v5920_v31  ;;  %v3487_v17 = vpop.f32.mrb[13].mxu0 }
 0x215   : > { %3706 = vst [vmem:[%s5948_s8 + $0x48] sm:$0xff] %v3670_v63  ;;  %v4578_v48 = vadd.f32 %v3487_v17, %v5922_v0  ;;  %v4542_v60 = vpop.f32.mrb[14].mxu0 }
 0x216   : > { %v3639_v24 = vadd.f32 %v4577_v9, %v5942_v49  ;;  %v4579_v54 = vadd.f32 %v4542_v60, %v5924_v56  ;;  %v3490_v38 = vpop.f32.mrb[15].mxu0 }
 0x217   : > { %v3637_v4 = vadd.f32 %v4578_v48, %v5942_v49  ;;  %v4580_v11 = vadd.f32 %v3490_v38, %v5926_v13 }
 0x218   : > { %v4397_v7 = vpop.f32.mrb[20].mxu1  ;;  %v3675_v6 = vmax.f32 %v3639_v24, 0.0  ;;  %v3640_v12 = vadd.f32 %v4579_v54, %v5942_v49 }
 0x219   : > { %v2005_v31 = vpop.f32.mrb[21].mxu1  ;;  %v3673_v0 = vmax.f32 %v3637_v4, 0.0  ;;  %v3638_v42 = vadd.f32 %v4580_v11, %v5942_v49 }
 0x21a   : > { %v4398_v30 = vpop.f32.mrb[22].mxu1  ;;  %3711 = vst [vmem:[%s5948_s8 + $0x70] sm:$0xff] %v3675_v6  ;;  %v3676_v50 = vmax.f32 %v3640_v12, 0.0 }
 0x21b   : > { %v2008_v46 = vpop.f32.mrb[23].mxu1  ;;  %3709 = vst [vmem:[%s5948_s8 + $0x60] sm:$0xff] %v3673_v0  ;;  %v3674_v56 = vmax.f32 %v3638_v42, 0.0  ;;  %v4545_v47 = vpop.f32.mrb[16].mxu0 }
 0x21c   : > { %3712 = vst [vmem:[%s5948_s8 + $0x78] sm:$0xff] %v3676_v50  ;;  %v4581_v37 = vadd.f32 %v4545_v47, %v5928_v15  ;;  %v3503_v18 = vpop.f32.mrb[17].mxu0 }
 0x21d   : > { %3710 = vst [vmem:[%s5948_s8 + $0x68] sm:$0xff] %v3674_v56  ;;  %v4582_v13 = vadd.f32 %v3503_v18, %v5930_v58  ;;  %v4546_v52 = vpop.f32.mrb[18].mxu0 }
 0x21e   : > { %v3643_v10 = vadd.f32 %v4581_v37, %v5942_v49  ;;  %v4583_v25 = vadd.f32 %v4546_v52, %v5932_v8  ;;  %v3506_v45 = vpop.f32.mrb[19].mxu0 }
 0x21f   : > { %v3641_v23 = vadd.f32 %v4582_v13, %v5942_v49  ;;  %v4584_v35 = vadd.f32 %v3506_v45, %v5934_v34 }
 0x220   : > { %v4401_v22 = vpop.f32.mrb[24].mxu1  ;;  %v3679_v53 = vmax.f32 %v3643_v10, 0.0  ;;  %v3644_v26 = vadd.f32 %v4583_v25, %v5942_v49 }
 0x221   : > { %v2021_v15 = vpop.f32.mrb[25].mxu1  ;;  %v3677_v58 = vmax.f32 %v3641_v23, 0.0  ;;  %v3642_v41 = vadd.f32 %v4584_v35, %v5942_v49 }
 0x222   : > { %v4402_v28 = vpop.f32.mrb[26].mxu1  ;;  %3715 = vst [vmem:[%s5948_s8 + $0x90] sm:$0xff] %v3679_v53  ;;  %v3680_v27 = vmax.f32 %v3644_v26, 0.0 }
 0x223   : > { %v2024_v2 = vpop.f32.mrb[27].mxu1  ;;  %3713 = vst [vmem:[%s5948_s8 + $0x80] sm:$0xff] %v3677_v58  ;;  %v3678_v8 = vmax.f32 %v3642_v41, 0.0  ;;  %v4549_v5 = vpop.f32.mrb[20].mxu0 }
 0x224   : > { %3716 = vst [vmem:[%s5948_s8 + $0x98] sm:$0xff] %v3680_v27  ;;  %v4585_v32 = vadd.f32 %v4549_v5, %v4397_v7  ;;  %v3519_v20 = vpop.f32.mrb[21].mxu0 }
 0x225   : > { %3714 = vst [vmem:[%s5948_s8 + $0x88] sm:$0xff] %v3678_v8  ;;  %v4586_v34 = vadd.f32 %v3519_v20, %v2005_v31  ;;  %v4550_v21 = vpop.f32.mrb[22].mxu0 }
 0x226   : > { %v3647_v44 = vadd.f32 %v4585_v32, %v5942_v49  ;;  %v4587_v55 = vadd.f32 %v4550_v21, %v4398_v30  ;;  %v3522_v40 = vpop.f32.mrb[23].mxu0 }
 0x227   : > { %v3645_v39 = vadd.f32 %v4586_v34, %v5942_v49  ;;  %v4588_v29 = vadd.f32 %v3522_v40, %v2008_v46 }
 0x228   : > { %v4405_v59 = vpop.f32.mrb[28].mxu1  ;;  %v3683_v36 = vmax.f32 %v3647_v44, 0.0  ;;  %v3648_v3 = vadd.f32 %v4587_v55, %v5942_v49 }
 0x229   : > { %v2037_v19 = vpop.f32.mrb[29].mxu1  ;;  %v3681_v33 = vmax.f32 %v3645_v39, 0.0  ;;  %v3646_v61 = vadd.f32 %v4588_v29, %v5942_v49 }
 0x22a   : > { %v4406_v43 = vpop.f32.mrb[30].mxu1  ;;  %3719 = vst [vmem:[%s5948_s8 + $0xb0] sm:$0xff] %v3683_v36  ;;  %v3684_v51 = vmax.f32 %v3648_v3, 0.0 }
 0x22b   : > { %v2040_v1 = vpop.f32.mrb[31].mxu1  ;;  %3717 = vst [vmem:[%s5948_s8 + $0xa0] sm:$0xff] %v3681_v33  ;;  %v3682_v62 = vmax.f32 %v3646_v61, 0.0  ;;  %v4553_v16 = vpop.f32.mrb[24].mxu0 }
 0x22c   : > { %3720 = vst [vmem:[%s5948_s8 + $0xb8] sm:$0xff] %v3684_v51  ;;  %v4589_v14 = vadd.f32 %v4553_v16, %v4401_v22  ;;  %v3535_v63 = vpop.f32.mrb[25].mxu0 }
 0x22d   : > { %3718 = vst [vmem:[%s5948_s8 + $0xa8] sm:$0xff] %v3682_v62  ;;  %v4590_v57 = vadd.f32 %v3535_v63, %v2021_v15  ;;  %v4554_v9 = vpop.f32.mrb[26].mxu0 }
 0x22e   : > { %v3651_v17 = vadd.f32 %v4589_v14, %v5942_v49  ;;  %v4591_v48 = vadd.f32 %v4554_v9, %v4402_v28  ;;  %v3538_v60 = vpop.f32.mrb[27].mxu0 }
 0x22f   : > { %v3649_v54 = vadd.f32 %v4590_v57, %v5942_v49  ;;  %v4592_v38 = vadd.f32 %v3538_v60, %v2024_v2 }
 0x230   : > { %v4409_v24 = vpop.f32.mrb[32].mxu1  ;;  %v3687_v4 = vmax.f32 %v3651_v17, 0.0  ;;  %v3652_v11 = vadd.f32 %v4591_v48, %v5942_v49 }
 0x231   : > { %v2053_v7 = vpop.f32.mrb[33].mxu1  ;;  %v3685_v6 = vmax.f32 %v3649_v54, 0.0  ;;  %v3650_v12 = vadd.f32 %v4592_v38, %v5942_v49 }
 0x232   : > { %v4410_v31 = vpop.f32.mrb[34].mxu1  ;;  %3723 = vst [vmem:[%s5948_s8 + $0xd0] sm:$0xff] %v3687_v4  ;;  %v3688_v0 = vmax.f32 %v3652_v11, 0.0 }
 0x233   : > { %v2056_v30 = vpop.f32.mrb[35].mxu1  ;;  %3721 = vst [vmem:[%s5948_s8 + $0xc0] sm:$0xff] %v3685_v6  ;;  %v3686_v42 = vmax.f32 %v3650_v12, 0.0  ;;  %v4557_v46 = vpop.f32.mrb[28].mxu0 }
 0x234   : > { %3724 = vst [vmem:[%s5948_s8 + $0xd8] sm:$0xff] %v3688_v0  ;;  %v4593_v50 = vadd.f32 %v4557_v46, %v4405_v59  ;;  %v3551_v56 = vpop.f32.mrb[29].mxu0 }
 0x235   : > { %3722 = vst [vmem:[%s5948_s8 + $0xc8] sm:$0xff] %v3686_v42  ;;  %v4594_v47 = vadd.f32 %v3551_v56, %v2037_v19  ;;  %v4558_v37 = vpop.f32.mrb[30].mxu0 }
 0x236   : > { %v3655_v18 = vadd.f32 %v4593_v50, %v5942_v49  ;;  %v4595_v13 = vadd.f32 %v4558_v37, %v4406_v43  ;;  %v3554_v52 = vpop.f32.mrb[31].mxu0 }
 0x237   : > { %v3653_v10 = vadd.f32 %v4594_v47, %v5942_v49  ;;  %v4596_v25 = vadd.f32 %v3554_v52, %v2040_v1 }
 0x238   : > { %v3691_v45 = vmax.f32 %v3655_v18, 0.0  ;;  %v3656_v22 = vadd.f32 %v4595_v13, %v5942_v49 }
 0x239   : > { %v3689_v23 = vmax.f32 %v3653_v10, 0.0  ;;  %v3654_v35 = vadd.f32 %v4596_v25, %v5942_v49 }
 0x23a   : > { %3727 = vst [vmem:[%s5948_s8 + $0xf0] sm:$0xff] %v3691_v45  ;;  %v3692_v15 = vmax.f32 %v3656_v22, 0.0 }
 0x23b   : > { %3725 = vst [vmem:[%s5948_s8 + $0xe0] sm:$0xff] %v3689_v23  ;;  %v3690_v53 = vmax.f32 %v3654_v35, 0.0  ;;  %v4561_v26 = vpop.f32.mrb[32].mxu0 }
 0x23c   : > { %3728 = vst [vmem:[%s5948_s8 + $0xf8] sm:$0xff] %v3692_v15  ;;  %v4597_v28 = vadd.f32 %v4561_v26, %v4409_v24  ;;  %v3567_v58 = vpop.f32.mrb[33].mxu0 }
 0x23d   : > { %3726 = vst [vmem:[%s5948_s8 + $0xe8] sm:$0xff] %v3690_v53  ;;  %v4598_v41 = vadd.f32 %v3567_v58, %v2053_v7  ;;  %v4562_v2 = vpop.f32.mrb[34].mxu0 }
 0x23e   : > { %v3659_v27 = vadd.f32 %v4597_v28, %v5942_v49  ;;  %v4599_v8 = vadd.f32 %v4562_v2, %v4410_v31  ;;  %v3570_v5 = vpop.f32.mrb[35].mxu0 }
 0x23f   : > { %v3657_v32 = vadd.f32 %v4598_v41, %v5942_v49  ;;  %v4600_v20 = vadd.f32 %v3570_v5, %v2056_v30 }
 0x240   : > { %v3695_v34 = vmax.f32 %v3659_v27, 0.0  ;;  %v3660_v21 = vadd.f32 %v4599_v8, %v5942_v49 }
 0x241   : > { %v3693_v44 = vmax.f32 %v3657_v32, 0.0  ;;  %v3658_v55 = vadd.f32 %v4600_v20, %v5942_v49 }
 0x242   : > { %3731 = vst [vmem:[%s5948_s8 + $0x110] sm:$0xff] %v3695_v34  ;;  %v3696_v40 = vmax.f32 %v3660_v21, 0.0 }
 0x243   : > { %3729 = vst [vmem:[%s5948_s8 + $0x100] sm:$0xff] %v3693_v44  ;;  %v3694_v59 = vmax.f32 %v3658_v55, 0.0 }
 0x244   : > { %3732 = vst [vmem:[%s5948_s8 + $0x118] sm:$0xff] %v3696_v40 }
 0x245   : > { %3730 = vst [vmem:[%s5948_s8 + $0x108] sm:$0xff] %v3694_v59 }
 0x246   : > { %4993 = shalt.err (!%p4990_p3)
}
 0x247   : > { %s4994_s27 = scalar_lea.hbm %s6028_s19, 4608  ;;  %s4998_s30 = scalar_lea.hbm %s6081_s3, 9216 }
 0x248   : > { %p4995_p4 = scmp.ne.s32.totalorder %s6028_s19, %s4994_s27  ;;  %p4999_p9 = scmp.lt.u32.totalorder %s6028_s19, %s6081_s3 }
 0x249   : > { %p5000_p10 = scmp.lt.u32.totalorder %s4998_s30, %s4994_s27  ;;  %p5002_p12 = scmp.lt.u32.totalorder %s4994_s27, %s6028_s19 }
 0x24a   : > { %p4996_p7 = pnand %p4995_p4, %p5105_p5 }
 0x24b   : > { %p5001_p11 = por %p5000_p10, %p4999_p9 }
 0x24c   : > { %p4997_p8 = pneg %p4996_p7 }
 0x24d   : > { %p5003_p13 = por %p5002_p12, %p5001_p11 }
 0x24f   : > { %p5004_p0 = pnand %p5003_p13, %p4997_p8 }
 0x251   : > { %5007 = shalt.err (!%p5004_p0)
}
 0x252   : > { %s5045_s6 = smov 128   ;;  %s5046_s7 = smov 8  }
 0x253   : > { %4866 = dma.vmem_to_hbm [thread:$0]  (%p5105_p5), %s6030_s10, 4608, %s6028_s19, %s6037_s16, %s5045_s6, %s5045_s6, %s5046_s7  }
 0x254 PF: > { %p4872_p1 = scmp.ge.s32.totalorder %s5042_s15, 2  ;;  %s3762_s8 = sand.u32 1, %s5030_s12  }
 0x255   : > { %s3763_s9 = scalar_lea.sflag [#allocation3], %s3762_s8 }
 0x256   : > { %p4869_p2 = pnand %p4872_p1, %p5109_p6 }
 0x258   : > { %5025 = dma.done.wait (!%p4869_p2), %s3763_s9, 4608  }
 0x259   : > { %5027 = vsyncadd (!%p4869_p2), %s3763_s9, 4294962688  ;;  %p13_p3 = scmp.ge.s32.totalorder %s5092_s18, 4   ;;  %s6084_s12 = smov %s5034_s13 }
 0x25a   : > { %s6085_s13 = smov %s5038_s14  ;;  %s6086_s14 = smov %s5103_s21 }
 0x25b   : > { %s6087_s15 = smov %s5092_s18  ;;  %15 = sbr.rel (!%p13_p3) target bundleno = 3 (0x3), region = 75 }
 0x262   :  { %3768 = vsyncpa [#allocation3], 1 }
 0x263   :  { %3770 = vsyncpa [#allocation3 + $0x1], 1 }

</bundles_post_ra>
